<compile_context>
chip_gen: v7x
topology: tpu7x:2x2x1
jax: 0.10.0
libtpu: 0.0.40
codegen_flags: <defaults>
</compile_context>

<pallas_src>
import math

import jax
import jax.numpy as jnp
from jax import lax
from jax.experimental import pallas as pl
from jax.experimental.pallas import tpu as pltpu

# ----------------------------- config ---------------------------------------
NUM_ASSETS = 8
D_MODEL = 32          # args.d_model
HIDDEN = 32           # args.hidden_size
NUM_LAYERS = 2        # args.num_layers (kernel is specialized to 2)
SEQ_LEN = 8           # args.seq_len
FC1_OUT = 64          # args.fc1_out
FC2_OUT = 32          # args.fc2_out
TIME_FEAT = 5         # freq='t' -> 5 time features
BATCH = 2
NEG_SLOPE = 0.01      # F.leaky_relu default negative slope

LANES = 8 * HIDDEN    # 256 : fused gate width (both layers, interleaved)
EMB_ROWS = 3 * NUM_ASSETS + TIME_FEAT + 1 + SEQ_LEN   # 38

_VMEM = pl.BlockSpec(memory_space=pltpu.MemorySpace.VMEM)


# ------------------- weight-slab layout (static row offsets) ------------------
def _align8(n):
    return (n + 7) & ~7


_SLAB_PIECES = [                       # (name, rows, cols)
    ("emb",   EMB_ROWS,          D_MODEL),   # packed DataEmbedding matrix
    ("wih0",  D_MODEL,           LANES),     # Wih0 scattered into layer-0 lanes
    ("bias",  1,                 LANES),     # b0 / b1 interleaved
    ("wrec",  2 * HIDDEN,        LANES),     # [[Whh0|Wih1],[0|Whh1]] interleaved
    ("fc1w",  SEQ_LEN * HIDDEN,  FC1_OUT),
    ("fc1b",  1,                 FC1_OUT),
    ("fc2w",  FC1_OUT,           FC2_OUT),
    ("fc2b",  1,                 FC2_OUT),
    ("fc3a",  FC2_OUT,           NUM_ASSETS),
    ("fc3b",  NUM_ASSETS,        NUM_ASSETS),
    ("fc3bb", 1,                 NUM_ASSETS),
]
_SLAB_OFF = {}
_SLAB_DIM = {}
_r = 0
for _name, _rows, _cols in _SLAB_PIECES:
    _SLAB_OFF[_name] = _r
    _SLAB_DIM[_name] = (_rows, _cols)
    _r = _align8(_r + _rows)           # keep every piece sublane-aligned
SLAB_ROWS = _r                         # 528 -> slab is (528, 256) f32 ~ 528 KB


# --------------------------- fused Pallas kernel ------------------------------
def _actor_kernel(x_ref, w_ref, pa_ref, out_ref):
    """Entire ActorLSTM forward in one kernel.

    x_ref:  (S*B, 38)       time-major rows (r = t*B + b) of
                            [x_prev | x | x_next | time_mark | 1 | onehot(t)]
    w_ref:  (528, 256)      packed weight slab (static row offsets above)
    pa_ref: (B, NA)         previous action
    out:    (B, NA)         softmax action weights
    """
    B = pa_ref.shape[0]
    NA = pa_ref.shape[1]
    H = HIDDEN
    S = SEQ_LEN
    G = LANES                                      # 8H fused gate width

    def w(name):
        r = _SLAB_OFF[name]
        rows, cols = _SLAB_DIM[name]
        return w_ref[r:r + rows, 0:cols]           # static slice -> cheap view

    # --- DataEmbedding: a single MXU matmul (dropout = identity at eval) ---
    embed = jnp.dot(x_ref[...], w("emb"),
                    preferred_element_type=jnp.float32)            # (S*B, D)

    # --- hoisted layer-0 input projection + both biases, already scattered to
    #     the interleaved fused-gate lane layout: ONE (S*B, D)@(D, 8H) matmul.
    gxb = jnp.dot(embed, w("wih0"),
                  preferred_element_type=jnp.float32) + w("bias")  # (S*B, 8H)

    # Lane masks for the fused gate layout [i0 i1 | f0 f1 | g0 g1 | o0 o1].
    lane = lax.broadcasted_iota(jnp.int32, (B, G), 1)
    g_mask = (lane >= 4 * H) & (lane < 6 * H)                      # "g" gates
    half = jnp.where(g_mask, 1.0, 0.5).astype(jnp.float32)         # x -> x/2 on i/f/o

    lane2 = lax.broadcasted_iota(jnp.int32, (B, 2 * H), 1)
    l0_mask = (lane2 < H).astype(jnp.float32)                      # layer-0 half

    w_rec = w("wrec")                                              # (2H, 8H)
    bias_w = w("bias")                                             # (1, 8H)

    # Fused carries: h_cat = [h0 | h1], c_cat = [c0 | c1].  h_cat is directly
    # the LHS of the per-step recurrence matmul.
    h_cat = jnp.zeros((B, 2 * H), jnp.float32)
    c_cat = jnp.zeros((B, 2 * H), jnp.float32)
    hs1 = []

    # Skewed fusion: combined step k computes layer-0 time step k and layer-1
    # time step k-1.  Static unroll, S+1 = 9 steps, 8 recurrence matmuls.
    for k in range(S + 1):
        if k == 0:
            gates = gxb[0:B, :]                    # h_cat == 0 -> no matmul needed
        else:
            comb = jnp.dot(h_cat, w_rec, preferred_element_type=jnp.float32)
            addend = gxb[k * B:(k + 1) * B, :] if k < S else bias_w
            gates = comb + addend
        # ONE tanh per step: sigmoid(x) = 0.5*tanh(x/2) + 0.5 on the i/f/o lanes.
        t = jnp.tanh(gates * half)
        act = jnp.where(g_mask, t, 0.5 * t + 0.5)
        i_cat = act[:, 0 * 2 * H:1 * 2 * H]
        f_cat = act[:, 1 * 2 * H:2 * 2 * H]
        g_cat = act[:, 2 * 2 * H:3 * 2 * H]
        o_cat = act[:, 3 * 2 * H:4 * 2 * H]
        c_cat = f_cat * c_cat + i_cat * g_cat      # both layers in one vreg slice
        h_cat = o_cat * jnp.tanh(c_cat)            # one tanh(c) for both layers
        if k == 0:
            # Layer-1's real recurrence starts at k=1; undo the bogus "t = -1"
            # layer-1 update done in the fused lanes above.
            h_cat = h_cat * l0_mask
            c_cat = c_cat * l0_mask
        if k >= 1:
            hs1.append(h_cat[:, H:2 * H])          # h1[k-1]
    # (at k == S the layer-0 half computed a junk extra step; it is never read.)

    # torch.flatten((B,S,H), start_dim=1): row b = [h1_0[b] | h1_1[b] | ... ]
    lstm_flat = jnp.concatenate(hs1, axis=1)       # (B, S*H = 256)

    # --- FC head ---
    def leaky(v):
        return jnp.where(v > 0, v, NEG_SLOPE * v)

    a = leaky(jnp.dot(lstm_flat, w("fc1w"),
                      preferred_element_type=jnp.float32) + w("fc1b"))
    a = leaky(jnp.dot(a, w("fc2w"),
                      preferred_element_type=jnp.float32) + w("fc2b"))   # drop=id
    # concat((a, prev_action)) @ W3 computed as a @ W3a + pa @ W3b (row-split).
    z = (jnp.dot(a, w("fc3a"), preferred_element_type=jnp.float32)
         + jnp.dot(pa_ref[...], w("fc3b"), preferred_element_type=jnp.float32)
         + w("fc3bb"))

    # L2 normalize along last dim (no epsilon, matching z / torch.norm(z)).
    z = z * lax.rsqrt(jnp.sum(z * z, axis=-1, keepdims=True))
    # softmax along last dim — EXACT divide (off the recurrent hot path).
    z = z - jnp.max(z, axis=-1, keepdims=True)
    e = jnp.exp(z)
    out_ref[...] = e / jnp.sum(e, axis=-1, keepdims=True)


# ------------------------------ host-side glue --------------------------------
def _positional_encoding(seq_len, d_model):
    pos = jnp.arange(seq_len, dtype=jnp.float32)[:, None]
    div = jnp.exp(jnp.arange(0, d_model, 2, dtype=jnp.float32)
                  * (-math.log(10000.0) / d_model))
    pe = jnp.zeros((seq_len, d_model), jnp.float32)
    pe = pe.at[:, 0::2].set(jnp.sin(pos * div))
    pe = pe.at[:, 1::2].set(jnp.cos(pos * div))
    return pe


def _interleave_gates(a0, a1):
    """(R,4H) layer-0 and (R,4H) layer-1 -> (R,8H) [i0 i1 | f0 f1 | g0 g1 | o0 o1]."""
    H = HIDDEN
    cols = []
    for g in range(4):
        cols.append(a0[:, g * H:(g + 1) * H])
        cols.append(a1[:, g * H:(g + 1) * H])
    return jnp.concatenate(cols, axis=1)


def pack_weights(params):
    """Pack ALL weights/biases into one (SLAB_ROWS, 256) f32 slab (done ONCE)."""
    D, H, S = D_MODEL, HIDDEN, SEQ_LEN
    l0, l1 = params["lstm"]

    emb_w = jnp.concatenate(
        [params["conv_w"][0], params["conv_w"][1], params["conv_w"][2],
         params["time_w"], params["time_b"], _positional_encoding(S, D)],
        axis=0)                                                     # (38, D)

    zeros4h = jnp.zeros((D, 4 * H), jnp.float32)
    wih0_wide = _interleave_gates(l0["w_ih"], zeros4h)              # (D, 8H)
    bias_wide = _interleave_gates(l0["b"], l1["b"])                 # (1, 8H)
    w_rec = jnp.concatenate(
        [_interleave_gates(l0["w_hh"], l1["w_ih"]),                 # rows for h0_prev
         _interleave_gates(jnp.zeros((H, 4 * H), jnp.float32), l1["w_hh"])],
        axis=0)                                                     # (2H, 8H)

    pieces = {
        "emb": emb_w, "wih0": wih0_wide, "bias": bias_wide, "wrec": w_rec,
        "fc1w": params["fc1_w"], "fc1b": params["fc1_b"],
        "fc2w": params["fc2_w"], "fc2b": params["fc2_b"],
        "fc3a": params["fc3_wa"], "fc3b": params["fc3_wb"], "fc3bb": params["fc3_b"],
    }
    slab = jnp.zeros((SLAB_ROWS, LANES), jnp.float32)
    for name, arr in pieces.items():
        r = _SLAB_OFF[name]
        rows, cols = _SLAB_DIM[name]
        assert arr.shape == (rows, cols), (name, arr.shape, (rows, cols))
        slab = slab.at[r:r + rows, 0:cols].set(arr.astype(jnp.float32))
    return slab


def actor_lstm_forward(w_slab, state, time_mark, prev_action):
    B, S, NA = state.shape
    # ---- tiny XLA glue: build the packed embedding input (time-major rows) ----
    st_tm = jnp.transpose(state, (1, 0, 2))          # (S, B, NA)
    tm_tm = jnp.transpose(time_mark, (1, 0, 2))      # (S, B, TF)
    x_prev = jnp.roll(st_tm, 1, axis=0)              # circular conv neighbours
    x_next = jnp.roll(st_tm, -1, axis=0)
    ones = jnp.ones((S, B, 1), jnp.float32)
    pos_onehot = jnp.broadcast_to(
        jnp.eye(S, dtype=jnp.float32)[:, None, :], (S, B, S))
    packed_in = jnp.concatenate(
        [x_prev, st_tm, x_next, tm_tm, ones, pos_onehot],
        axis=-1).reshape(S * B, EMB_ROWS)            # (S*B, 38)

    action = pl.pallas_call(
        _actor_kernel,
        out_shape=jax.ShapeDtypeStruct((B, NA), jnp.float32),
        in_specs=[_VMEM, _VMEM, _VMEM],              # 3 operands -> 3 DMAs
        out_specs=_VMEM,
    )(packed_in, w_slab, prev_action)
    # .squeeze() is a no-op for B > 1, NUM_ASSETS > 1
    return action


# --------------------------- pure-JAX reference --------------------------------
def reference_forward(params, state, time_mark, prev_action):
    B, S, NA = state.shape
    st = jnp.transpose(state, (1, 0, 2))
    x_prev = jnp.roll(st, 1, axis=0)
    x_next = jnp.roll(st, -1, axis=0)
    tok = (jnp.einsum('sbn,nd->sbd', x_prev, params["conv_w"][0])
           + jnp.einsum('sbn,nd->sbd', st, params["conv_w"][1])
           + jnp.einsum('sbn,nd->sbd', x_next, params["conv_w"][2]))
    tfe = jnp.einsum('sbt,td->sbd', jnp.transpose(time_mark, (1, 0, 2)),
                     params["time_w"]) + params["time_b"]
    embed = tok + tfe + _positional_encoding(S, D_MODEL)[:, None, :]   # (S,B,D)

    def lstm_layer(x, layer):
        H = HIDDEN
        h = jnp.zeros((B, H), jnp.float32)
        c = jnp.zeros((B, H), jnp.float32)
        hs = []
        for t in range(S):
            g = x[t] @ layer["w_ih"] + h @ layer["w_hh"] + layer["b"]
            i = jax.nn.sigmoid(g[:, 0:H])
            f = jax.nn.sigmoid(g[:, H:2 * H])
            gg = jnp.tanh(g[:, 2 * H:3 * H])
            o = jax.nn.sigmoid(g[:, 3 * H:4 * H])
            c = f * c + i * gg
            h = o * jnp.tanh(c)
            hs.append(h)
        return jnp.stack(hs, axis=0)                 # (S, B, H)

    h0 = lstm_layer(embed, params["lstm"][0])
    h1 = lstm_layer(h0, params["lstm"][1])
    flat = jnp.transpose(h1, (1, 0, 2)).reshape(B, S * HIDDEN)

    leaky = lambda v: jnp.where(v > 0, v, NEG_SLOPE * v)
    a = leaky(flat @ params["fc1_w"] + params["fc1_b"])
    a = leaky(a @ params["fc2_w"] + params["fc2_b"])
    w3 = jnp.concatenate([params["fc3_wa"], params["fc3_wb"]], axis=0)
    z = jnp.concatenate([a, prev_action], axis=-1) @ w3 + params["fc3_b"]
    z = z / jnp.linalg.norm(z, axis=-1, keepdims=True)
    return jax.nn.softmax(z, axis=-1)


# --------------------------- parameter init ----------------------------------
def init_params(key):
    keys = iter(jax.random.split(key, 32))

    def uni(shape, bound):
        return jax.random.uniform(next(keys), shape, jnp.float32, -bound, bound)

    # TokenEmbedding Conv1d(NA -> D, k=3, bias=False): torch weight (D, NA, 3)
    # reorganized to (3 taps, NA, D) so out[t] = sum_k x[t+k-1] @ conv_w[k]
    conv_bound = 1.0 / math.sqrt(NUM_ASSETS * 3)
    conv_w = uni((3, NUM_ASSETS, D_MODEL), conv_bound)

    # TimeFeatureEmbedding: Linear(TIME_FEAT -> D)
    t_bound = 1.0 / math.sqrt(TIME_FEAT)
    time_w = uni((TIME_FEAT, D_MODEL), t_bound)
    time_b = uni((1, D_MODEL), t_bound)

    lstm_layers = []
    h_bound = 1.0 / math.sqrt(HIDDEN)
    for layer in range(NUM_LAYERS):
        in_dim = D_MODEL if layer == 0 else HIDDEN
        lstm_layers.append({
            "w_ih": uni((in_dim, 4 * HIDDEN), h_bound),        # W_ih^T, gates i,f,g,o
            "w_hh": uni((HIDDEN, 4 * HIDDEN), h_bound),        # W_hh^T
            "b": uni((1, 4 * HIDDEN), h_bound)
                 + uni((1, 4 * HIDDEN), h_bound),              # b_ih + b_hh
        })

    fc1_bound = 1.0 / math.sqrt(HIDDEN * SEQ_LEN)
    fc1_w = uni((HIDDEN * SEQ_LEN, FC1_OUT), fc1_bound)
    fc1_b = uni((1, FC1_OUT), fc1_bound)

    fc2_bound = 1.0 / math.sqrt(FC1_OUT)
    fc2_w = uni((FC1_OUT, FC2_OUT), fc2_bound)
    fc2_b = uni((1, FC2_OUT), fc2_bound)

    fc3_in = FC2_OUT + NUM_ASSETS
    fc3_bound = 1.0 / math.sqrt(fc3_in)
    fc3_w = uni((fc3_in, NUM_ASSETS), fc3_bound)               # W3^T
    fc3_b = uni((1, NUM_ASSETS), fc3_bound)

    return {
        "conv_w": conv_w, "time_w": time_w, "time_b": time_b,
        "lstm": lstm_layers,
        "fc1_w": fc1_w, "fc1_b": fc1_b,
        "fc2_w": fc2_w, "fc2_b": fc2_b,
        "fc3_wa": fc3_w[:FC2_OUT], "fc3_wb": fc3_w[FC2_OUT:], "fc3_b": fc3_b,
    }


# ------------------------------- main -----------------------------------------
if __name__ == "__main__":
    key = jax.random.PRNGKey(0)
    pk, sk, tk, ak = jax.random.split(key, 4)

    params = init_params(pk)
    w_slab = pack_weights(params)                    # packed ONCE, reused per call
    state = jax.random.normal(sk, (BATCH, SEQ_LEN, NUM_ASSETS), jnp.float32)
    time_mark = jax.random.normal(tk, (BATCH, SEQ_LEN, TIME_FEAT), jnp.float32)
    prev_action = jax.nn.softmax(
        jax.random.normal(ak, (BATCH, NUM_ASSETS), jnp.float32), axis=-1)

    fwd = jax.jit(actor_lstm_forward)
    out = fwd(w_slab, state, time_mark, prev_action)
    out = jax.block_until_ready(out)

    assert out.shape == (BATCH, NUM_ASSETS), out.shape
    assert bool(jnp.all(jnp.isfinite(out)))
    # softmax rows sum to 1 (exact divide in kernel)
    assert bool(jnp.all(jnp.abs(jnp.sum(out, axis=-1) - 1.0) < 1e-4))
    # check fused / skewed kernel against the plain-JAX reference
    ref = jax.block_until_ready(
        reference_forward(params, state, time_mark, prev_action))
    max_err = float(jnp.max(jnp.abs(out - ref)))
    assert max_err < 1e-4, f"kernel vs reference max abs err {max_err}"
    print("KERNEL_OK")
</pallas_src>

<mosaic_0001>
module attributes {stable_mosaic.version = 11 : i64} {
  func.func @_actor_kernel(%arg0: memref<16x38xf32, #tpu.memory_space<vmem>>, %arg1: memref<528x256xf32, #tpu.memory_space<vmem>>, %arg2: memref<2x8xf32, #tpu.memory_space<vmem>>, %arg3: memref<2x8xf32, #tpu.memory_space<vmem>>) attributes {dimension_semantics = [], scalar_prefetch = 0 : i64, scratch_operands = 0 : i64, tpu.core_type = #tpu.core_type<tc>} {
    %c0 = arith.constant 0 : index
    %c0_0 = arith.constant 0 : index
    %0 = vector.load %arg0[%c0, %c0_0] : memref<16x38xf32, #tpu.memory_space<vmem>>, vector<16x38xf32>
    %c0_1 = arith.constant 0 : index
    %c0_2 = arith.constant 0 : index
    %1 = vector.load %arg1[%c0_1, %c0_2] : memref<528x256xf32, #tpu.memory_space<vmem>>, vector<38x32xf32>
    %cst = arith.constant dense<0.000000e+00> : vector<16x32xf32>
    %2 = tpu.matmul %0, %1, %cst {dimension_numbers = #tpu.dot_dimension_numbers<[1], [0], [0], [1], [0, 0, 1, 1], [], []>} : vector<16x38xf32>, vector<38x32xf32>, vector<16x32xf32> -> vector<16x32xf32>
    %c40 = arith.constant 40 : index
    %c0_3 = arith.constant 0 : index
    %3 = vector.load %arg1[%c40, %c0_3] : memref<528x256xf32, #tpu.memory_space<vmem>>, vector<32x256xf32>
    %cst_4 = arith.constant dense<0.000000e+00> : vector<16x256xf32>
    %4 = tpu.matmul %2, %3, %cst_4 {dimension_numbers = #tpu.dot_dimension_numbers<[1], [0], [0], [1], [0, 0, 1, 1], [], []>} : vector<16x32xf32>, vector<32x256xf32>, vector<16x256xf32> -> vector<16x256xf32>
    %c72 = arith.constant 72 : index
    %c0_5 = arith.constant 0 : index
    %5 = vector.load %arg1[%c72, %c0_5] : memref<528x256xf32, #tpu.memory_space<vmem>>, vector<1x256xf32>
    %6 = vector.broadcast %5 : vector<1x256xf32> to vector<16x256xf32>
    %7 = arith.addf %4, %6 : vector<16x256xf32>
    %8 = tpu.iota {dimensions = array<i32: 1>} : vector<2x256xi32>
    %c128_i32 = arith.constant 128 : i32
    %9 = vector.broadcast %c128_i32 : i32 to vector<2x256xi32>
    %10 = arith.cmpi sge, %8, %9 : vector<2x256xi32>
    %c192_i32 = arith.constant 192 : i32
    %11 = vector.broadcast %c192_i32 : i32 to vector<2x256xi32>
    %12 = arith.cmpi slt, %8, %11 : vector<2x256xi32>
    %13 = arith.andi %10, %12 : vector<2x256xi1>
    %cst_6 = arith.constant 1.000000e+00 : f32
    %cst_7 = arith.constant 5.000000e-01 : f32
    %14 = vector.broadcast %cst_6 : f32 to vector<2x256xf32>
    %15 = vector.broadcast %cst_7 : f32 to vector<2x256xf32>
    %16 = arith.select %13, %14, %15 : vector<2x256xi1>, vector<2x256xf32>
    %17 = tpu.iota {dimensions = array<i32: 1>} : vector<2x64xi32>
    %c32_i32 = arith.constant 32 : i32
    %18 = vector.broadcast %c32_i32 : i32 to vector<2x64xi32>
    %19 = arith.cmpi slt, %17, %18 : vector<2x64xi32>
    %20 = arith.extui %19 : vector<2x64xi1> to vector<2x64xi32>
    %21 = arith.sitofp %20 : vector<2x64xi32> to vector<2x64xf32>
    %c80 = arith.constant 80 : index
    %c0_8 = arith.constant 0 : index
    %22 = vector.load %arg1[%c80, %c0_8] : memref<528x256xf32, #tpu.memory_space<vmem>>, vector<64x256xf32>
    %c72_9 = arith.constant 72 : index
    %c0_10 = arith.constant 0 : index
    %23 = vector.load %arg1[%c72_9, %c0_10] : memref<528x256xf32, #tpu.memory_space<vmem>>, vector<1x256xf32>
    %cst_11 = arith.constant 0.000000e+00 : f32
    %24 = vector.broadcast %cst_11 : f32 to vector<2x64xf32>
    %25 = vector.extract_strided_slice %7 {offsets = [0, 0], sizes = [2, 256], strides = [1, 1]} : vector<16x256xf32> to vector<2x256xf32>
    %26 = arith.mulf %25, %16 : vector<2x256xf32>
    %27 = math.tanh %26 : vector<2x256xf32>
    %cst_12 = arith.constant 5.000000e-01 : f32
    %28 = vector.broadcast %cst_12 : f32 to vector<2x256xf32>
    %29 = arith.mulf %28, %27 : vector<2x256xf32>
    %cst_13 = arith.constant 5.000000e-01 : f32
    %30 = vector.broadcast %cst_13 : f32 to vector<2x256xf32>
    %31 = arith.addf %29, %30 : vector<2x256xf32>
    %32 = arith.select %13, %27, %31 : vector<2x256xi1>, vector<2x256xf32>
    %33 = vector.extract_strided_slice %32 {offsets = [0, 0], sizes = [2, 64], strides = [1, 1]} : vector<2x256xf32> to vector<2x64xf32>
    %34 = vector.extract_strided_slice %32 {offsets = [0, 64], sizes = [2, 64], strides = [1, 1]} : vector<2x256xf32> to vector<2x64xf32>
    %35 = vector.extract_strided_slice %32 {offsets = [0, 128], sizes = [2, 64], strides = [1, 1]} : vector<2x256xf32> to vector<2x64xf32>
    %36 = vector.extract_strided_slice %32 {offsets = [0, 192], sizes = [2, 64], strides = [1, 1]} : vector<2x256xf32> to vector<2x64xf32>
    %37 = arith.mulf %34, %24 : vector<2x64xf32>
    %38 = arith.mulf %33, %35 : vector<2x64xf32>
    %39 = arith.addf %37, %38 : vector<2x64xf32>
    %40 = math.tanh %39 : vector<2x64xf32>
    %41 = arith.mulf %36, %40 : vector<2x64xf32>
    %42 = arith.mulf %41, %21 : vector<2x64xf32>
    %43 = arith.mulf %39, %21 : vector<2x64xf32>
    %cst_14 = arith.constant dense<0.000000e+00> : vector<2x256xf32>
    %44 = tpu.matmul %42, %22, %cst_14 {dimension_numbers = #tpu.dot_dimension_numbers<[1], [0], [0], [1], [0, 0, 1, 1], [], []>} : vector<2x64xf32>, vector<64x256xf32>, vector<2x256xf32> -> vector<2x256xf32>
    %45 = vector.extract_strided_slice %7 {offsets = [2, 0], sizes = [2, 256], strides = [1, 1]} : vector<16x256xf32> to vector<2x256xf32>
    %46 = arith.addf %44, %45 : vector<2x256xf32>
    %47 = arith.mulf %46, %16 : vector<2x256xf32>
    %48 = math.tanh %47 : vector<2x256xf32>
    %cst_15 = arith.constant 5.000000e-01 : f32
    %49 = vector.broadcast %cst_15 : f32 to vector<2x256xf32>
    %50 = arith.mulf %49, %48 : vector<2x256xf32>
    %cst_16 = arith.constant 5.000000e-01 : f32
    %51 = vector.broadcast %cst_16 : f32 to vector<2x256xf32>
    %52 = arith.addf %50, %51 : vector<2x256xf32>
    %53 = arith.select %13, %48, %52 : vector<2x256xi1>, vector<2x256xf32>
    %54 = vector.extract_strided_slice %53 {offsets = [0, 0], sizes = [2, 64], strides = [1, 1]} : vector<2x256xf32> to vector<2x64xf32>
    %55 = vector.extract_strided_slice %53 {offsets = [0, 64], sizes = [2, 64], strides = [1, 1]} : vector<2x256xf32> to vector<2x64xf32>
    %56 = vector.extract_strided_slice %53 {offsets = [0, 128], sizes = [2, 64], strides = [1, 1]} : vector<2x256xf32> to vector<2x64xf32>
    %57 = vector.extract_strided_slice %53 {offsets = [0, 192], sizes = [2, 64], strides = [1, 1]} : vector<2x256xf32> to vector<2x64xf32>
    %58 = arith.mulf %55, %43 : vector<2x64xf32>
    %59 = arith.mulf %54, %56 : vector<2x64xf32>
    %60 = arith.addf %58, %59 : vector<2x64xf32>
    %61 = math.tanh %60 : vector<2x64xf32>
    %62 = arith.mulf %57, %61 : vector<2x64xf32>
    %63 = vector.extract_strided_slice %62 {offsets = [0, 32], sizes = [2, 32], strides = [1, 1]} : vector<2x64xf32> to vector<2x32xf32>
    %cst_17 = arith.constant dense<0.000000e+00> : vector<2x256xf32>
    %64 = tpu.matmul %62, %22, %cst_17 {dimension_numbers = #tpu.dot_dimension_numbers<[1], [0], [0], [1], [0, 0, 1, 1], [], []>} : vector<2x64xf32>, vector<64x256xf32>, vector<2x256xf32> -> vector<2x256xf32>
    %65 = vector.extract_strided_slice %7 {offsets = [4, 0], sizes = [2, 256], strides = [1, 1]} : vector<16x256xf32> to vector<2x256xf32>
    %66 = arith.addf %64, %65 : vector<2x256xf32>
    %67 = arith.mulf %66, %16 : vector<2x256xf32>
    %68 = math.tanh %67 : vector<2x256xf32>
    %cst_18 = arith.constant 5.000000e-01 : f32
    %69 = vector.broadcast %cst_18 : f32 to vector<2x256xf32>
    %70 = arith.mulf %69, %68 : vector<2x256xf32>
    %cst_19 = arith.constant 5.000000e-01 : f32
    %71 = vector.broadcast %cst_19 : f32 to vector<2x256xf32>
    %72 = arith.addf %70, %71 : vector<2x256xf32>
    %73 = arith.select %13, %68, %72 : vector<2x256xi1>, vector<2x256xf32>
    %74 = vector.extract_strided_slice %73 {offsets = [0, 0], sizes = [2, 64], strides = [1, 1]} : vector<2x256xf32> to vector<2x64xf32>
    %75 = vector.extract_strided_slice %73 {offsets = [0, 64], sizes = [2, 64], strides = [1, 1]} : vector<2x256xf32> to vector<2x64xf32>
    %76 = vector.extract_strided_slice %73 {offsets = [0, 128], sizes = [2, 64], strides = [1, 1]} : vector<2x256xf32> to vector<2x64xf32>
    %77 = vector.extract_strided_slice %73 {offsets = [0, 192], sizes = [2, 64], strides = [1, 1]} : vector<2x256xf32> to vector<2x64xf32>
    %78 = arith.mulf %75, %60 : vector<2x64xf32>
    %79 = arith.mulf %74, %76 : vector<2x64xf32>
    %80 = arith.addf %78, %79 : vector<2x64xf32>
    %81 = math.tanh %80 : vector<2x64xf32>
    %82 = arith.mulf %77, %81 : vector<2x64xf32>
    %83 = vector.extract_strided_slice %82 {offsets = [0, 32], sizes = [2, 32], strides = [1, 1]} : vector<2x64xf32> to vector<2x32xf32>
    %cst_20 = arith.constant dense<0.000000e+00> : vector<2x256xf32>
    %84 = tpu.matmul %82, %22, %cst_20 {dimension_numbers = #tpu.dot_dimension_numbers<[1], [0], [0], [1], [0, 0, 1, 1], [], []>} : vector<2x64xf32>, vector<64x256xf32>, vector<2x256xf32> -> vector<2x256xf32>
    %85 = vector.extract_strided_slice %7 {offsets = [6, 0], sizes = [2, 256], strides = [1, 1]} : vector<16x256xf32> to vector<2x256xf32>
    %86 = arith.addf %84, %85 : vector<2x256xf32>
    %87 = arith.mulf %86, %16 : vector<2x256xf32>
    %88 = math.tanh %87 : vector<2x256xf32>
    %cst_21 = arith.constant 5.000000e-01 : f32
    %89 = vector.broadcast %cst_21 : f32 to vector<2x256xf32>
    %90 = arith.mulf %89, %88 : vector<2x256xf32>
    %cst_22 = arith.constant 5.000000e-01 : f32
    %91 = vector.broadcast %cst_22 : f32 to vector<2x256xf32>
    %92 = arith.addf %90, %91 : vector<2x256xf32>
    %93 = arith.select %13, %88, %92 : vector<2x256xi1>, vector<2x256xf32>
    %94 = vector.extract_strided_slice %93 {offsets = [0, 0], sizes = [2, 64], strides = [1, 1]} : vector<2x256xf32> to vector<2x64xf32>
    %95 = vector.extract_strided_slice %93 {offsets = [0, 64], sizes = [2, 64], strides = [1, 1]} : vector<2x256xf32> to vector<2x64xf32>
    %96 = vector.extract_strided_slice %93 {offsets = [0, 128], sizes = [2, 64], strides = [1, 1]} : vector<2x256xf32> to vector<2x64xf32>
    %97 = vector.extract_strided_slice %93 {offsets = [0, 192], sizes = [2, 64], strides = [1, 1]} : vector<2x256xf32> to vector<2x64xf32>
    %98 = arith.mulf %95, %80 : vector<2x64xf32>
    %99 = arith.mulf %94, %96 : vector<2x64xf32>
    %100 = arith.addf %98, %99 : vector<2x64xf32>
    %101 = math.tanh %100 : vector<2x64xf32>
    %102 = arith.mulf %97, %101 : vector<2x64xf32>
    %103 = vector.extract_strided_slice %102 {offsets = [0, 32], sizes = [2, 32], strides = [1, 1]} : vector<2x64xf32> to vector<2x32xf32>
    %cst_23 = arith.constant dense<0.000000e+00> : vector<2x256xf32>
    %104 = tpu.matmul %102, %22, %cst_23 {dimension_numbers = #tpu.dot_dimension_numbers<[1], [0], [0], [1], [0, 0, 1, 1], [], []>} : vector<2x64xf32>, vector<64x256xf32>, vector<2x256xf32> -> vector<2x256xf32>
    %105 = vector.extract_strided_slice %7 {offsets = [8, 0], sizes = [2, 256], strides = [1, 1]} : vector<16x256xf32> to vector<2x256xf32>
    %106 = arith.addf %104, %105 : vector<2x256xf32>
    %107 = arith.mulf %106, %16 : vector<2x256xf32>
    %108 = math.tanh %107 : vector<2x256xf32>
    %cst_24 = arith.constant 5.000000e-01 : f32
    %109 = vector.broadcast %cst_24 : f32 to vector<2x256xf32>
    %110 = arith.mulf %109, %108 : vector<2x256xf32>
    %cst_25 = arith.constant 5.000000e-01 : f32
    %111 = vector.broadcast %cst_25 : f32 to vector<2x256xf32>
    %112 = arith.addf %110, %111 : vector<2x256xf32>
    %113 = arith.select %13, %108, %112 : vector<2x256xi1>, vector<2x256xf32>
    %114 = vector.extract_strided_slice %113 {offsets = [0, 0], sizes = [2, 64], strides = [1, 1]} : vector<2x256xf32> to vector<2x64xf32>
    %115 = vector.extract_strided_slice %113 {offsets = [0, 64], sizes = [2, 64], strides = [1, 1]} : vector<2x256xf32> to vector<2x64xf32>
    %116 = vector.extract_strided_slice %113 {offsets = [0, 128], sizes = [2, 64], strides = [1, 1]} : vector<2x256xf32> to vector<2x64xf32>
    %117 = vector.extract_strided_slice %113 {offsets = [0, 192], sizes = [2, 64], strides = [1, 1]} : vector<2x256xf32> to vector<2x64xf32>
    %118 = arith.mulf %115, %100 : vector<2x64xf32>
    %119 = arith.mulf %114, %116 : vector<2x64xf32>
    %120 = arith.addf %118, %119 : vector<2x64xf32>
    %121 = math.tanh %120 : vector<2x64xf32>
    %122 = arith.mulf %117, %121 : vector<2x64xf32>
    %123 = vector.extract_strided_slice %122 {offsets = [0, 32], sizes = [2, 32], strides = [1, 1]} : vector<2x64xf32> to vector<2x32xf32>
    %cst_26 = arith.constant dense<0.000000e+00> : vector<2x256xf32>
    %124 = tpu.matmul %122, %22, %cst_26 {dimension_numbers = #tpu.dot_dimension_numbers<[1], [0], [0], [1], [0, 0, 1, 1], [], []>} : vector<2x64xf32>, vector<64x256xf32>, vector<2x256xf32> -> vector<2x256xf32>
    %125 = vector.extract_strided_slice %7 {offsets = [10, 0], sizes = [2, 256], strides = [1, 1]} : vector<16x256xf32> to vector<2x256xf32>
    %126 = arith.addf %124, %125 : vector<2x256xf32>
    %127 = arith.mulf %126, %16 : vector<2x256xf32>
    %128 = math.tanh %127 : vector<2x256xf32>
    %cst_27 = arith.constant 5.000000e-01 : f32
    %129 = vector.broadcast %cst_27 : f32 to vector<2x256xf32>
    %130 = arith.mulf %129, %128 : vector<2x256xf32>
    %cst_28 = arith.constant 5.000000e-01 : f32
    %131 = vector.broadcast %cst_28 : f32 to vector<2x256xf32>
    %132 = arith.addf %130, %131 : vector<2x256xf32>
    %133 = arith.select %13, %128, %132 : vector<2x256xi1>, vector<2x256xf32>
    %134 = vector.extract_strided_slice %133 {offsets = [0, 0], sizes = [2, 64], strides = [1, 1]} : vector<2x256xf32> to vector<2x64xf32>
    %135 = vector.extract_strided_slice %133 {offsets = [0, 64], sizes = [2, 64], strides = [1, 1]} : vector<2x256xf32> to vector<2x64xf32>
    %136 = vector.extract_strided_slice %133 {offsets = [0, 128], sizes = [2, 64], strides = [1, 1]} : vector<2x256xf32> to vector<2x64xf32>
    %137 = vector.extract_strided_slice %133 {offsets = [0, 192], sizes = [2, 64], strides = [1, 1]} : vector<2x256xf32> to vector<2x64xf32>
    %138 = arith.mulf %135, %120 : vector<2x64xf32>
    %139 = arith.mulf %134, %136 : vector<2x64xf32>
    %140 = arith.addf %138, %139 : vector<2x64xf32>
    %141 = math.tanh %140 : vector<2x64xf32>
    %142 = arith.mulf %137, %141 : vector<2x64xf32>
    %143 = vector.extract_strided_slice %142 {offsets = [0, 32], sizes = [2, 32], strides = [1, 1]} : vector<2x64xf32> to vector<2x32xf32>
    %cst_29 = arith.constant dense<0.000000e+00> : vector<2x256xf32>
    %144 = tpu.matmul %142, %22, %cst_29 {dimension_numbers = #tpu.dot_dimension_numbers<[1], [0], [0], [1], [0, 0, 1, 1], [], []>} : vector<2x64xf32>, vector<64x256xf32>, vector<2x256xf32> -> vector<2x256xf32>
    %145 = vector.extract_strided_slice %7 {offsets = [12, 0], sizes = [2, 256], strides = [1, 1]} : vector<16x256xf32> to vector<2x256xf32>
    %146 = arith.addf %144, %145 : vector<2x256xf32>
    %147 = arith.mulf %146, %16 : vector<2x256xf32>
    %148 = math.tanh %147 : vector<2x256xf32>
    %cst_30 = arith.constant 5.000000e-01 : f32
    %149 = vector.broadcast %cst_30 : f32 to vector<2x256xf32>
    %150 = arith.mulf %149, %148 : vector<2x256xf32>
    %cst_31 = arith.constant 5.000000e-01 : f32
    %151 = vector.broadcast %cst_31 : f32 to vector<2x256xf32>
    %152 = arith.addf %150, %151 : vector<2x256xf32>
    %153 = arith.select %13, %148, %152 : vector<2x256xi1>, vector<2x256xf32>
    %154 = vector.extract_strided_slice %153 {offsets = [0, 0], sizes = [2, 64], strides = [1, 1]} : vector<2x256xf32> to vector<2x64xf32>
    %155 = vector.extract_strided_slice %153 {offsets = [0, 64], sizes = [2, 64], strides = [1, 1]} : vector<2x256xf32> to vector<2x64xf32>
    %156 = vector.extract_strided_slice %153 {offsets = [0, 128], sizes = [2, 64], strides = [1, 1]} : vector<2x256xf32> to vector<2x64xf32>
    %157 = vector.extract_strided_slice %153 {offsets = [0, 192], sizes = [2, 64], strides = [1, 1]} : vector<2x256xf32> to vector<2x64xf32>
    %158 = arith.mulf %155, %140 : vector<2x64xf32>
    %159 = arith.mulf %154, %156 : vector<2x64xf32>
    %160 = arith.addf %158, %159 : vector<2x64xf32>
    %161 = math.tanh %160 : vector<2x64xf32>
    %162 = arith.mulf %157, %161 : vector<2x64xf32>
    %163 = vector.extract_strided_slice %162 {offsets = [0, 32], sizes = [2, 32], strides = [1, 1]} : vector<2x64xf32> to vector<2x32xf32>
    %cst_32 = arith.constant dense<0.000000e+00> : vector<2x256xf32>
    %164 = tpu.matmul %162, %22, %cst_32 {dimension_numbers = #tpu.dot_dimension_numbers<[1], [0], [0], [1], [0, 0, 1, 1], [], []>} : vector<2x64xf32>, vector<64x256xf32>, vector<2x256xf32> -> vector<2x256xf32>
    %165 = vector.extract_strided_slice %7 {offsets = [14, 0], sizes = [2, 256], strides = [1, 1]} : vector<16x256xf32> to vector<2x256xf32>
    %166 = arith.addf %164, %165 : vector<2x256xf32>
    %167 = arith.mulf %166, %16 : vector<2x256xf32>
    %168 = math.tanh %167 : vector<2x256xf32>
    %cst_33 = arith.constant 5.000000e-01 : f32
    %169 = vector.broadcast %cst_33 : f32 to vector<2x256xf32>
    %170 = arith.mulf %169, %168 : vector<2x256xf32>
    %cst_34 = arith.constant 5.000000e-01 : f32
    %171 = vector.broadcast %cst_34 : f32 to vector<2x256xf32>
    %172 = arith.addf %170, %171 : vector<2x256xf32>
    %173 = arith.select %13, %168, %172 : vector<2x256xi1>, vector<2x256xf32>
    %174 = vector.extract_strided_slice %173 {offsets = [0, 0], sizes = [2, 64], strides = [1, 1]} : vector<2x256xf32> to vector<2x64xf32>
    %175 = vector.extract_strided_slice %173 {offsets = [0, 64], sizes = [2, 64], strides = [1, 1]} : vector<2x256xf32> to vector<2x64xf32>
    %176 = vector.extract_strided_slice %173 {offsets = [0, 128], sizes = [2, 64], strides = [1, 1]} : vector<2x256xf32> to vector<2x64xf32>
    %177 = vector.extract_strided_slice %173 {offsets = [0, 192], sizes = [2, 64], strides = [1, 1]} : vector<2x256xf32> to vector<2x64xf32>
    %178 = arith.mulf %175, %160 : vector<2x64xf32>
    %179 = arith.mulf %174, %176 : vector<2x64xf32>
    %180 = arith.addf %178, %179 : vector<2x64xf32>
    %181 = math.tanh %180 : vector<2x64xf32>
    %182 = arith.mulf %177, %181 : vector<2x64xf32>
    %183 = vector.extract_strided_slice %182 {offsets = [0, 32], sizes = [2, 32], strides = [1, 1]} : vector<2x64xf32> to vector<2x32xf32>
    %cst_35 = arith.constant dense<0.000000e+00> : vector<2x256xf32>
    %184 = tpu.matmul %182, %22, %cst_35 {dimension_numbers = #tpu.dot_dimension_numbers<[1], [0], [0], [1], [0, 0, 1, 1], [], []>} : vector<2x64xf32>, vector<64x256xf32>, vector<2x256xf32> -> vector<2x256xf32>
    %185 = vector.broadcast %23 : vector<1x256xf32> to vector<2x256xf32>
    %186 = arith.addf %184, %185 : vector<2x256xf32>
    %187 = arith.mulf %186, %16 : vector<2x256xf32>
    %188 = math.tanh %187 : vector<2x256xf32>
    %cst_36 = arith.constant 5.000000e-01 : f32
    %189 = vector.broadcast %cst_36 : f32 to vector<2x256xf32>
    %190 = arith.mulf %189, %188 : vector<2x256xf32>
    %cst_37 = arith.constant 5.000000e-01 : f32
    %191 = vector.broadcast %cst_37 : f32 to vector<2x256xf32>
    %192 = arith.addf %190, %191 : vector<2x256xf32>
    %193 = arith.select %13, %188, %192 : vector<2x256xi1>, vector<2x256xf32>
    %194 = vector.extract_strided_slice %193 {offsets = [0, 0], sizes = [2, 64], strides = [1, 1]} : vector<2x256xf32> to vector<2x64xf32>
    %195 = vector.extract_strided_slice %193 {offsets = [0, 64], sizes = [2, 64], strides = [1, 1]} : vector<2x256xf32> to vector<2x64xf32>
    %196 = vector.extract_strided_slice %193 {offsets = [0, 128], sizes = [2, 64], strides = [1, 1]} : vector<2x256xf32> to vector<2x64xf32>
    %197 = vector.extract_strided_slice %193 {offsets = [0, 192], sizes = [2, 64], strides = [1, 1]} : vector<2x256xf32> to vector<2x64xf32>
    %198 = arith.mulf %195, %180 : vector<2x64xf32>
    %199 = arith.mulf %194, %196 : vector<2x64xf32>
    %200 = arith.addf %198, %199 : vector<2x64xf32>
    %201 = math.tanh %200 : vector<2x64xf32>
    %202 = arith.mulf %197, %201 : vector<2x64xf32>
    %203 = vector.extract_strided_slice %202 {offsets = [0, 32], sizes = [2, 32], strides = [1, 1]} : vector<2x64xf32> to vector<2x32xf32>
    %204 = tpu.concatenate %63, %83, %103, %123, %143, %163, %183, %203 in 1 : vector<2x32xf32>, vector<2x32xf32>, vector<2x32xf32>, vector<2x32xf32>, vector<2x32xf32>, vector<2x32xf32>, vector<2x32xf32>, vector<2x32xf32> -> vector<2x256xf32>
    %c144 = arith.constant 144 : index
    %c0_38 = arith.constant 0 : index
    %205 = vector.load %arg1[%c144, %c0_38] : memref<528x256xf32, #tpu.memory_space<vmem>>, vector<256x64xf32>
    %cst_39 = arith.constant dense<0.000000e+00> : vector<2x64xf32>
    %206 = tpu.matmul %204, %205, %cst_39 {dimension_numbers = #tpu.dot_dimension_numbers<[1], [0], [0], [1], [0, 0, 1, 1], [], []>} : vector<2x256xf32>, vector<256x64xf32>, vector<2x64xf32> -> vector<2x64xf32>
    %c400 = arith.constant 400 : index
    %c0_40 = arith.constant 0 : index
    %207 = vector.load %arg1[%c400, %c0_40] : memref<528x256xf32, #tpu.memory_space<vmem>>, vector<1x64xf32>
    %208 = vector.broadcast %207 : vector<1x64xf32> to vector<2x64xf32>
    %209 = arith.addf %206, %208 : vector<2x64xf32>
    %cst_41 = arith.constant 0.000000e+00 : f32
    %210 = vector.broadcast %cst_41 : f32 to vector<2x64xf32>
    %211 = arith.cmpf ogt, %209, %210 : vector<2x64xf32>
    %cst_42 = arith.constant 0.00999999977 : f32
    %212 = vector.broadcast %cst_42 : f32 to vector<2x64xf32>
    %213 = arith.mulf %212, %209 : vector<2x64xf32>
    %214 = arith.select %211, %209, %213 : vector<2x64xi1>, vector<2x64xf32>
    %c408 = arith.constant 408 : index
    %c0_43 = arith.constant 0 : index
    %215 = vector.load %arg1[%c408, %c0_43] : memref<528x256xf32, #tpu.memory_space<vmem>>, vector<64x32xf32>
    %cst_44 = arith.constant dense<0.000000e+00> : vector<2x32xf32>
    %216 = tpu.matmul %214, %215, %cst_44 {dimension_numbers = #tpu.dot_dimension_numbers<[1], [0], [0], [1], [0, 0, 1, 1], [], []>} : vector<2x64xf32>, vector<64x32xf32>, vector<2x32xf32> -> vector<2x32xf32>
    %c472 = arith.constant 472 : index
    %c0_45 = arith.constant 0 : index
    %217 = vector.load %arg1[%c472, %c0_45] : memref<528x256xf32, #tpu.memory_space<vmem>>, vector<1x32xf32>
    %218 = vector.broadcast %217 : vector<1x32xf32> to vector<2x32xf32>
    %219 = arith.addf %216, %218 : vector<2x32xf32>
    %cst_46 = arith.constant 0.000000e+00 : f32
    %220 = vector.broadcast %cst_46 : f32 to vector<2x32xf32>
    %221 = arith.cmpf ogt, %219, %220 : vector<2x32xf32>
    %cst_47 = arith.constant 0.00999999977 : f32
    %222 = vector.broadcast %cst_47 : f32 to vector<2x32xf32>
    %223 = arith.mulf %222, %219 : vector<2x32xf32>
    %224 = arith.select %221, %219, %223 : vector<2x32xi1>, vector<2x32xf32>
    %c480 = arith.constant 480 : index
    %c0_48 = arith.constant 0 : index
    %225 = vector.load %arg1[%c480, %c0_48] : memref<528x256xf32, #tpu.memory_space<vmem>>, vector<32x8xf32>
    %cst_49 = arith.constant dense<0.000000e+00> : vector<2x8xf32>
    %226 = tpu.matmul %224, %225, %cst_49 {dimension_numbers = #tpu.dot_dimension_numbers<[1], [0], [0], [1], [0, 0, 1, 1], [], []>} : vector<2x32xf32>, vector<32x8xf32>, vector<2x8xf32> -> vector<2x8xf32>
    %c0_50 = arith.constant 0 : index
    %c0_51 = arith.constant 0 : index
    %227 = vector.load %arg2[%c0_50, %c0_51] : memref<2x8xf32, #tpu.memory_space<vmem>>, vector<2x8xf32>
    %c512 = arith.constant 512 : index
    %c0_52 = arith.constant 0 : index
    %228 = vector.load %arg1[%c512, %c0_52] : memref<528x256xf32, #tpu.memory_space<vmem>>, vector<8x8xf32>
    %cst_53 = arith.constant dense<0.000000e+00> : vector<2x8xf32>
    %229 = tpu.matmul %227, %228, %cst_53 {dimension_numbers = #tpu.dot_dimension_numbers<[1], [0], [0], [1], [0, 0, 1, 1], [], []>} : vector<2x8xf32>, vector<8x8xf32>, vector<2x8xf32> -> vector<2x8xf32>
    %230 = arith.addf %226, %229 : vector<2x8xf32>
    %c520 = arith.constant 520 : index
    %c0_54 = arith.constant 0 : index
    %231 = vector.load %arg1[%c520, %c0_54] : memref<528x256xf32, #tpu.memory_space<vmem>>, vector<1x8xf32>
    %232 = vector.broadcast %231 : vector<1x8xf32> to vector<2x8xf32>
    %233 = arith.addf %230, %232 : vector<2x8xf32>
    %234 = arith.mulf %233, %233 : vector<2x8xf32>
    %cst_55 = arith.constant dense<0.000000e+00> : vector<2xf32>
    %235 = vector.multi_reduction <add>, %234, %cst_55 [1] : vector<2x8xf32> to vector<2xf32>
    %236 = vector.shape_cast %235 : vector<2xf32> to vector<2x1xf32>
    %237 = math.rsqrt %236 : vector<2x1xf32>
    %238 = vector.broadcast %237 : vector<2x1xf32> to vector<2x8xf32>
    %239 = arith.mulf %233, %238 : vector<2x8xf32>
    %cst_56 = arith.constant dense<0xFF800000> : vector<2xf32>
    %240 = vector.multi_reduction <maximumf>, %239, %cst_56 [1] : vector<2x8xf32> to vector<2xf32>
    %241 = vector.shape_cast %240 : vector<2xf32> to vector<2x1xf32>
    %242 = vector.broadcast %241 : vector<2x1xf32> to vector<2x8xf32>
    %243 = arith.subf %239, %242 : vector<2x8xf32>
    %244 = math.exp %243 : vector<2x8xf32>
    %cst_57 = arith.constant dense<0.000000e+00> : vector<2xf32>
    %245 = vector.multi_reduction <add>, %244, %cst_57 [1] : vector<2x8xf32> to vector<2xf32>
    %246 = vector.shape_cast %245 : vector<2xf32> to vector<2x1xf32>
    %247 = vector.broadcast %246 : vector<2x1xf32> to vector<2x8xf32>
    %248 = arith.divf %244, %247 : vector<2x8xf32>
    %c0_58 = arith.constant 0 : index
    %c0_59 = arith.constant 0 : index
    %249 = vector.load %arg3[%c0_58, %c0_59] : memref<2x8xf32, #tpu.memory_space<vmem>>, vector<2x8xf32>
    tpu.vector_store %arg3[%c0_58, %c0_59], %248 {strides = array<i32>} : memref<2x8xf32, #tpu.memory_space<vmem>>, vector<2x8xf32>,
    return
  }
}

</mosaic_0001>

<bundles_post_ra>
// kernel: actor_lstm_forward.1
= control target key start
LH: loop header
LB: loop body
LE: loop exit
PB: predicated region body
PF: predicated region fallthrough
CT: control target
= control target key end

     0   :  { %8 = vsyncpa [#allocation3], 0  ;;  %s2232_s0 = inlined_call_operand.vmem [shape: f32[16,38], index: 0, kind: input, shape index: {}]   ;;  %s2233_s1 = inlined_call_operand.hbm [shape: f32[528,256], index: 1, kind: input, shape index: {}]   ;;  %s2234_s2 = inlined_call_operand.vmem [shape: f32[2,8], index: 2, kind: input, shape index: {}]   ;;  %s2235_s3 = inlined_call_operand.hbm [shape: f32[2,8], index: 3, kind: output, shape index: {}]  }
   0x1   :  { %9 = vsyncpa [#allocation4], 0  ;;  %s1918_s12 = smov [#allocation2]   ;;  %s1870_s16 = scalar_lea.hbm %s2233_s1, 16896 }
   0x2   :  { %s17_s13 = sshll.u32 %s1918_s12, 4  ;;  %p1871_p0 = scmp.ne.s32.totalorder %s2233_s1, %s1870_s16  ;;  %s18_s13 = int_to_ptr.vmem [resolvable:$true] %s17_s13 }
   0x3   :  { %p1874_p1 = scmp.lt.u32.totalorder %s1870_s16, %s2233_s1 }
   0x5   :  { %p1876_p2 = pnand %p1874_p1, %p1871_p0 }
   0x7   :  { %1879 = shalt.err (!%p1876_p2)
}
   0x8   :  { %s1880_s21 = scalar_lea.vmem %s18_s13, 16896  ;;  %p1885_p4 = scmp.lt.s32.totalorder %s18_s13, %s18_s13 }
   0x9   :  { %p1881_p3 = scmp.ne.s32.totalorder %s18_s13, %s1880_s21  ;;  %p1886_p5 = scmp.lt.s32.totalorder %s1880_s21, %s1880_s21 }
   0xb   :  { %p1887_p6 = por %p1886_p5, %p1885_p4 }
   0xd   :  { %p1888_p7 = pnand %p1887_p6, %p1881_p3 }
   0xf   :  { %1891 = shalt.err (!%p1888_p7)
}
  0x10   :  { %s1919_s22 = smov 256   ;;  %s1920_s23 = smov 16  }
  0x11   :  { %23 = dma.hbm_to_vmem [thread:$0]  %s2233_s1, 16896, %s18_s13, [#allocation3], %s1919_s22, %s1919_s22, %s1920_s23  }
  0x12   :  { %1914 = dma.done.wait [#allocation3], 16896  }
  0x13   :  { %1915 = vsyncadd [#allocation3], 4294950400  ;;  %vm36_vm0 = vcmask 310272   ;;  %v31_v0 = vld [vmem:[#allocation2] sm:$0xff]  ;;  %v32_v1 = vld [vmem:[#allocation2 + $0x10] sm:$0xff]  ;;  %vm43_vm1 = vcmask 1045504   ;;  %v133_v24 = vlaneseq }
  0x14   :  { %v33_v2 = vld [vmem:[#allocation2 + $0x20] sm:$0xff]  ;;  %v1595_v3 = vpack.c.bf16 %v32_v1, %v31_v0  ;;  %v34_v4 = vld [vmem:[#allocation2 + $0x30] sm:$0xff]  ;;  %v123_v7 = vld [vmem:[#allocation2 + $0x58] sm:$0xff]  ;;  %v1921_v21 = vmov 0.0   ;;  %vm143_vm2 = vcmask 261120   ;;  %v1922_v36 = vmov 0.5  }
  0x15   :  { %v29_v5 = vld [vmem:[%s2232_s0] sm:$0xff]  ;;  %v1599_v6 = vpack.c.bf16 %v34_v4, %v33_v2  ;;  %v125_v8 = vld [vmem:[#allocation2 + $0x68] sm:$0xff]  ;;  %v122_v10 = vld [vmem:[#allocation2 + $0x50] sm:$0xff]  ;;  %214 = vmatprep.mubr.f32.mxu1 %v1921_v21  ;;  %v134_v25 = vshrl.u32 %v133_v24, 7  ;;  %v228_v26 = vand.u32 127, %v133_v24  ;;  %vm291_vm5 = vcmask 523264  }
  0x16   :  { %1557 = vmatprep.mubr.msk.f32.mxu0 %vm36_vm0, %v29_v5  ;;  %1596 = vmatprep.subr.bf16.mxu0 %v1595_v3  ;;  %v1603_v9 = vpack.c.bf16 %v125_v8, %v123_v7  ;;  %v124_v11 = vld [vmem:[#allocation2 + $0x60] sm:$0xff]  ;;  %v127_v12 = vld [vmem:[#allocation2 + $0x78] sm:$0xff]  ;;  %v129_v14 = vld [vmem:[#allocation2 + $0x88] sm:$0xff]  ;;  %s1924_s29 = smov 32   ;;  %s1925_s30 = smov 96   ;;  %vm1087_vm6 = vcmask 785408  }
  0x17   :  { %1598 = vmatpush3.bf16.msra.mxu0 %v1595_v3  ;;  %v1605_v13 = vpack.c.bf16 %v124_v11, %v122_v10  ;;  %v126_v15 = vld [vmem:[#allocation2 + $0x70] sm:$0xff]  ;;  %v128_v16 = vld [vmem:[#allocation2 + $0x80] sm:$0xff]  ;;  %v1607_v17 = vpack.c.bf16 %v129_v14, %v127_v12  ;;  %v30_v20 = vld [vmem:[%s2232_s0 + $0x8] sm:$0xff]  ;;  %v135_v27 = vsub.s32 0, %v134_v25  ;;  %v1975_v29 = vadd.s32 128, %v228_v26  ;;  %s1923_s0 = smov 64  }
  0x18   :  { %1600 = vmatprep.subr.bf16.mxu0 %v1599_v6  ;;  %1604 = vmatprep.subr.bf16.mxu1 %v1603_v9  ;;  %v35_v18 = vld [vmem:[#allocation2 + $0x40] sm:$0x3f]  ;;  %v1609_v19 = vpack.c.bf16 %v128_v16, %v126_v15  ;;  %v131_v28 = vld [vmem:[#allocation2 + $0x90] ss:$8 sm:$0x3]  ;;  %v139_v30 = vsub.s32 1, %v134_v25 }
  0x19   :  { %1606 = vmatpush1.bf16.msra.mxu1 %v1605_v13  ;;  %v1977_v31 = vrot.slane %v131_v28, %v135_v27  ;;  %vm233_vm3 = vcmp.lt.s32.totalorder %v1975_v29, 192  ;;  %vm238_vm4 = vcmp.lt.s32.totalorder %v228_v26, 32  ;;  %v242_v52 = vld [vmem:[#allocation2 + $0xa8] sm:$0xff]  ;;  %v244_v53 = vld [vmem:[#allocation2 + $0xb8] sm:$0xff]  ;;  %v241_v54 = vld [vmem:[#allocation2 + $0xa0] sm:$0xff]  ;;  %vm1927_vm7 = vmmov 0  }
  0x1a   :  { %1608 = vmatprep.subr.bf16.mxu1 %v1607_v17  ;;  %v1980_v32 = vrot.slane %v131_v28, %v139_v30  ;;  %v1987_v37 = vsel %vm233_vm3, 1.0, %v1922_v36  ;;  %v1477_v51 = vsel %vm238_vm4, 1.0, %v1921_v21  ;;  %v2004_v55 = vpack.c.bf16 %v244_v53, %v242_v52  ;;  %v243_v56 = vld [vmem:[#allocation2 + $0xb0] sm:$0xff]  ;;  %v246_v57 = vld [vmem:[#allocation2 + $0xc8] sm:$0xff]  ;;  %v248_v58 = vld [vmem:[#allocation2 + $0xd8] sm:$0xff] }
  0x1b   :  { %1602 = vmatpush3.bf16.msra.mxu0 %v1599_v6  ;;  %v2006_v59 = vpack.c.bf16 %v243_v56, %v241_v54  ;;  %v2008_v60 = vpack.c.bf16 %v248_v58, %v246_v57  ;;  %v245_v61 = vld [vmem:[#allocation2 + $0xc0] sm:$0xff]  ;;  %v247_v62 = vld [vmem:[#allocation2 + $0xd0] sm:$0xff]  ;;  %v250_v63 = vld [vmem:[#allocation2 + $0xe8] sm:$0xff]  ;;  %vm1289_vm9 = vcmask 64512   ;;  %vm1439_vm11 = vcmask 58368  }
  0x1c   :  { %1555 = vmatprep.subr.msk.mxu0 %vm43_vm1, %v35_v18  ;;  %v252_v0 = vld [vmem:[#allocation2 + $0xf8] sm:$0xff]  ;;  %v2013_v1 = vpack.c.bf16 %v247_v62, %v245_v61  ;;  %v249_v3 = vld [vmem:[#allocation2 + $0xe0] sm:$0xff]  ;;  %v251_v4 = vld [vmem:[#allocation2 + $0xf0] sm:$0xff] }
  0x1d   :  { %1610 = vmatpush1.bf16.msra.mxu1 %v1609_v19  ;;  %v2017_v2 = vpack.c.bf16 %v252_v0, %v250_v63  ;;  %v254_v5 = vld [vmem:[#allocation2 + $0x108] sm:$0xff]  ;;  %v256_v6 = vld [vmem:[#allocation2 + $0x118] sm:$0xff]  ;;  %v2021_v7 = vpack.c.bf16 %v251_v4, %v249_v3  ;;  %v253_v9 = vld [vmem:[#allocation2 + $0x100] sm:$0xff] }
  0x1e   :  { %1612 = vmatprep.subr.bf16.mxu1 %v2004_v55  ;;  %v2025_v8 = vpack.c.bf16 %v256_v6, %v254_v5  ;;  %v255_v10 = vld [vmem:[#allocation2 + $0x110] sm:$0xff] }
  0x1f   :  { %1556 = vmatpush3.msk.msra.mxu0 %vm43_vm1, %v35_v18  ;;  %v2029_v11 = vpack.c.bf16 %v255_v10, %v253_v9 }
  0x20   :  { %1558 = vmatmul.mubr.msk.f32.vlgmr.msra.gmra.mrb[0].mxu0 %vm36_vm0, %v30_v20  ;;  %1628 = vmatprep.subr.bf16.mxu0 %v2004_v55 }
  0x21   :  { %457 = vmatprep.mubr.f32.mxu0 %v1921_v21  ;;  %1630 = vmatpush1.bf16.msra.mxu0 %v2006_v59 }
  0x22   :  { %1632 = vmatprep.subr.bf16.mxu0 %v2008_v60 }
  0x25   :  { %1634 = vmatpush1.bf16.msra.mxu0 %v2013_v1 }
  0x26   :  { %1636 = vmatprep.subr.bf16.mxu0 %v2017_v2 }
  0x29   :  { %1638 = vmatpush1.bf16.msra.mxu0 %v2021_v7 }
  0x2a   :  { %1640 = vmatprep.subr.bf16.mxu0 %v2025_v8 }
  0x2d   :  { %1642 = vmatpush1.bf16.msra.mxu0 %v2029_v11 }
  0x2e   :  { %1660 = vmatprep.subr.bf16.mxu0 %v2004_v55 }
  0xf3   :  { %v1559_v22 = vpop.f32.mrb[0].mxu0 }
  0xf4   :  { %v113_v23 = vpop.f32.mrb[1].mxu0 }
  0xf5   :  { %1475 = vmatmul.mubr.msk.f32.vlgmr.msra.gmra.mrb[0].mxu1 %vm143_vm2, %v113_v23 }
  0xf6   :  { %220 = vmatprep.mubr.f32.mxu1 %v1921_v21  ;;  %1614 = vmatpush1.bf16.msra.mxu1 %v2006_v59 }
  0xf7   :  { %1616 = vmatprep.subr.bf16.mxu1 %v2008_v60 }
  0xf9   :  { %1476 = vmatmul.mubr.msk.f32.gmra.mrb[2].mxu1 %vm143_vm2, %v1559_v22 }
  0xfa   :  { %358 = vmatprep.mubr.f32.mxu1 %v1921_v21  ;;  %1618 = vmatpush1.bf16.msra.mxu1 %v2013_v1 }
  0xfb   :  { %1620 = vmatprep.subr.bf16.mxu1 %v2017_v2 }
  0xfe   :  { %1622 = vmatpush1.bf16.msra.mxu1 %v2021_v7 }
  0xff   :  { %1624 = vmatprep.subr.bf16.mxu1 %v2025_v8 }
 0x102   :  { %1626 = vmatpush1.bf16.msra.mxu1 %v2029_v11 }
 0x103   :  { %1644 = vmatprep.subr.bf16.mxu1 %v2004_v55 }
 0x1c8   :  { %v216_v33 = vpop.f32.mrb[0].mxu1 }
 0x1c9   :  { %v1983_v34 = vadd.f32 %v216_v33, %v1977_v31  ;;  %v218_v35 = vpop.f32.mrb[1].mxu1 }
 0x1ca   :  { %v1990_v38 = vadd.f32 %v218_v35, %v1980_v32 }
 0x1cb   :  { %v257_v39 = vmul.f32 0.5, %v1983_v34  ;;  %v287_v20 = vrot.slane %v1983_v34, 2  ;;  %v387_v52 = vrot.slane %v1983_v34, 4 }
 0x1cc   :  { %v258_v40 = vmul.f32 %v1987_v37, %v1990_v38  ;;  %v1995_v41 = vpop.f32.mrb[2].mxu1  ;;  %v288_v23 = vrot.slane %v1990_v38, 2  ;;  %v388_v54 = vrot.slane %v1990_v38, 4 }
 0x1cd   :  { %v1997_v42 = vpop.f32.mrb[3].mxu1  ;;  %1810 = vtanh.f32 %v257_v39 }
 0x1ce   :  { %1812 = vtanh.f32 %v258_v40 }
 0x1d7   :  { %v1811_v43 = vpop.eup %1810 }
 0x1d8   :  { %v1813_v44 = vpop.eup %1812  ;;  %v261_v45 = vmul.f32 0.5, %v1811_v43 }
 0x1d9   :  { %v262_v46 = vmul.f32 0.5, %v1813_v44 }
 0x1da   :  { %v263_v48 = vadd.f32 0.5, %v261_v45 }
 0x1db   :  { %v264_v47 = vadd.f32 0.5, %v262_v46 }
 0x1dc   :  { %v267_v12 = vmul.f32 0.0, %v263_v48 }
 0x1dd   :  { %v266_v49 = vsel %vm233_vm3, %v1813_v44, %v264_v47 }
 0x1de   :  { %v268_v50 = vmul.f32 %v266_v49, %v263_v48 }
 0x1e0   :  { %270 = vrot.lane.b32.xlu0 %v268_v50, %s1923_s0 }
 0x1e4   :  { %277 = vrot.lane.b32.xlu0 %v1477_v51, %s1923_s0 }
 0x252   :  { %v271_v13 = vpop.permute.xlu0 %270 }
 0x253   :  { %v273_v14 = vadd.f32 %v271_v13, %v267_v12 }
 0x255   :  { %1814 = vtanh.f32 %v273_v14 }
 0x256   :  { %v278_v17 = vpop.permute.xlu0 %277 }
 0x257   :  { %v281_v39 = vmul.f32 %v278_v17, %v273_v14 }
 0x25f   :  { %v1815_v15 = vpop.eup %1814 }
 0x260   :  { %v275_v16 = vmul.f32 %v1815_v15, %v266_v49 }
 0x262   :  { %v280_v18 = vmul.f32 %v278_v17, %v275_v16 }
 0x264   :  { %283 = vrot.lane.b32.xlu1 %v280_v18, %s1923_s0  ;;  %v486_v18 = vrot.slane %v1983_v34, 6 }
 0x2d6   :  { %v284_v19 = vpop.permute.xlu1 %283 }
 0x2d7   :  { %1478 = vmatmul.mubr.msk.f32.vlgmr.msra.gmra.mrb[4].mxu1 %vm291_vm5, %v284_v19 }
 0x2d8   :  { %1646 = vmatpush1.bf16.msra.mxu1 %v2006_v59  ;;  %556 = vmatprep.mubr.f32.mxu1 %v1921_v21 }
 0x2d9   :  { %1648 = vmatprep.subr.bf16.mxu1 %v2008_v60 }
 0x2dc   :  { %1650 = vmatpush1.bf16.msra.mxu1 %v2013_v1 }
 0x2dd   :  { %1652 = vmatprep.subr.bf16.mxu1 %v2017_v2 }
 0x2e0   :  { %1654 = vmatpush1.bf16.msra.mxu1 %v2021_v7 }
 0x2e1   :  { %1656 = vmatprep.subr.bf16.mxu1 %v2025_v8 }
 0x2e4   :  { %1658 = vmatpush1.bf16.msra.mxu1 %v2029_v11 }
 0x2e5   :  { %1676 = vmatprep.subr.bf16.mxu1 %v2004_v55 }
 0x3aa   :  { %v360_v22 = vpop.f32.mrb[4].mxu1 }
 0x3ab   :  { %v361_v24 = vadd.f32 %v360_v22, %v287_v20  ;;  %v362_v25 = vpop.f32.mrb[5].mxu1  ;;  %v487_v20 = vrot.slane %v1990_v38, 6 }
 0x3ac   :  { %v363_v26 = vadd.f32 %v362_v25, %v288_v23 }
 0x3ad   :  { %v365_v27 = vmul.f32 0.5, %v361_v24 }
 0x3ae   :  { %v366_v28 = vmul.f32 %v363_v26, %v1987_v37 }
 0x3af   :  { %1816 = vtanh.f32 %v365_v27 }
 0x3b0   :  { %1818 = vtanh.f32 %v366_v28 }
 0x3b9   :  { %v1817_v30 = vpop.eup %1816 }
 0x3ba   :  { %v1819_v33 = vpop.eup %1818  ;;  %v369_v35 = vmul.f32 0.5, %v1817_v30 }
 0x3bb   :  { %v370_v36 = vmul.f32 0.5, %v1819_v33 }
 0x3bc   :  { %v371_v40 = vadd.f32 0.5, %v369_v35 }
 0x3bd   :  { %v372_v43 = vadd.f32 0.5, %v370_v36 }
 0x3be   :  { %v375_v44 = vmul.f32 %v371_v40, %v281_v39 }
 0x3bf   :  { %v374_v45 = vsel %vm233_vm3, %v1819_v33, %v372_v43 }
 0x3c0   :  { %v376_v46 = vmul.f32 %v374_v45, %v371_v40 }
 0x3c2   :  { %378 = vrot.lane.b32.xlu1 %v376_v46, %s1923_s0 }
 0x434   :  { %v379_v47 = vpop.permute.xlu1 %378 }
 0x435   :  { %v381_v48 = vadd.f32 %v379_v47, %v375_v44  ;;  %v2111_v47 = vadd.f32 %v1995_v41, %v1977_v31 }
 0x437   :  { %1820 = vtanh.f32 %v381_v48 }
 0x441   :  { %v1821_v49 = vpop.eup %1820 }
 0x442   :  { %v2055_v50 = vmul.f32 %v1821_v49, %v374_v45 }
 0x444   :  { %385 = vrot.lane.b32.xlu0 %v2055_v50, %s1923_s0 }
 0x4b6   :  { %v386_v51 = vpop.permute.xlu0 %385 }
 0x4b7   :  { %1479 = vmatmul.mubr.msk.f32.vlgmr.msra.gmra.mrb[2].mxu0 %vm291_vm5, %v386_v51 }
 0x4b8   :  { %1662 = vmatpush1.bf16.msra.mxu0 %v2006_v59  ;;  %651 = vmatprep.mubr.f32.mxu0 %v1921_v21 }
 0x4b9   :  { %1664 = vmatprep.subr.bf16.mxu0 %v2008_v60 }
 0x4bc   :  { %1666 = vmatpush1.bf16.msra.mxu0 %v2013_v1 }
 0x4bd   :  { %1668 = vmatprep.subr.bf16.mxu0 %v2017_v2 }
 0x4c0   :  { %1670 = vmatpush1.bf16.msra.mxu0 %v2021_v7 }
 0x4c1   :  { %1672 = vmatprep.subr.bf16.mxu0 %v2025_v8 }
 0x4c4   :  { %1674 = vmatpush1.bf16.msra.mxu0 %v2029_v11 }
 0x4c5   :  { %1692 = vmatprep.subr.bf16.mxu0 %v2004_v55 }
 0x58a   :  { %v459_v53 = vpop.f32.mrb[2].mxu0 }
 0x58b   :  { %v460_v56 = vadd.f32 %v459_v53, %v387_v52  ;;  %v461_v57 = vpop.f32.mrb[3].mxu0 }
 0x58c   :  { %v462_v58 = vadd.f32 %v461_v57, %v388_v54 }
 0x58d   :  { %v464_v61 = vmul.f32 0.5, %v460_v56 }
 0x58e   :  { %v465_v62 = vmul.f32 %v462_v58, %v1987_v37 }
 0x58f   :  { %1822 = vtanh.f32 %v464_v61 }
 0x590   :  { %1824 = vtanh.f32 %v465_v62 }
 0x599   :  { %v1823_v63 = vpop.eup %1822 }
 0x59a   :  { %v1825_v0 = vpop.eup %1824  ;;  %v468_v3 = vmul.f32 0.5, %v1823_v63 }
 0x59b   :  { %v469_v4 = vmul.f32 0.5, %v1825_v0 }
 0x59c   :  { %v470_v6 = vadd.f32 0.5, %v468_v3 }
 0x59d   :  { %v471_v5 = vadd.f32 0.5, %v469_v4 }
 0x59e   :  { %v474_v12 = vmul.f32 %v470_v6, %v381_v48  ;;  %v2115_v48 = vadd.f32 %v1997_v42, %v1980_v32 }
 0x59f   :  { %v473_v9 = vsel %vm233_vm3, %v1825_v0, %v471_v5 }
 0x5a0   :  { %v475_v10 = vmul.f32 %v473_v9, %v470_v6 }
 0x5a2   :  { %477 = vrot.lane.b32.xlu1 %v475_v10, %s1923_s0  ;;  %v682_v10 = vrot.slane %v2111_v47, 2 }
 0x614   :  { %v478_v13 = vpop.permute.xlu1 %477 }
 0x615   :  { %v480_v14 = vadd.f32 %v478_v13, %v474_v12  ;;  %v683_v13 = vrot.slane %v2115_v48, 2 }
 0x617   :  { %1826 = vtanh.f32 %v480_v14 }
 0x621   :  { %v1827_v15 = vpop.eup %1826 }
 0x622   :  { %v482_v16 = vmul.f32 %v1827_v15, %v473_v9 }
 0x624   :  { %484 = vrot.lane.b32.xlu0 %v482_v16, %s1923_s0 }
 0x696   :  { %v2076_v17 = vpop.permute.xlu0 %484 }
 0x697   :  { %1480 = vmatmul.mubr.msk.f32.vlgmr.msra.gmra.mrb[6].mxu1 %vm291_vm5, %v2076_v17 }
 0x698   :  { %1678 = vmatpush1.bf16.msra.mxu1 %v2006_v59  ;;  %752 = vmatprep.mubr.f32.mxu1 %v1921_v21 }
 0x699   :  { %1680 = vmatprep.subr.bf16.mxu1 %v2008_v60 }
 0x69c   :  { %1682 = vmatpush1.bf16.msra.mxu1 %v2013_v1 }
 0x69d   :  { %1684 = vmatprep.subr.bf16.mxu1 %v2017_v2 }
 0x6a0   :  { %1686 = vmatpush1.bf16.msra.mxu1 %v2021_v7 }
 0x6a1   :  { %1688 = vmatprep.subr.bf16.mxu1 %v2025_v8 }
 0x6a4   :  { %1690 = vmatpush1.bf16.msra.mxu1 %v2029_v11 }
 0x6a5   :  { %1708 = vmatprep.subr.bf16.mxu1 %v2004_v55 }
 0x76a   :  { %v558_v19 = vpop.f32.mrb[6].mxu1 }
 0x76b   :  { %v559_v22 = vadd.f32 %v558_v19, %v486_v18  ;;  %v560_v23 = vpop.f32.mrb[7].mxu1 }
 0x76c   :  { %v561_v24 = vadd.f32 %v560_v23, %v487_v20 }
 0x76d   :  { %v563_v25 = vmul.f32 0.5, %v559_v22 }
 0x76e   :  { %v564_v26 = vmul.f32 %v561_v24, %v1987_v37 }
 0x76f   :  { %1828 = vtanh.f32 %v563_v25 }
 0x770   :  { %1830 = vtanh.f32 %v564_v26 }
 0x779   :  { %v1829_v27 = vpop.eup %1828 }
 0x77a   :  { %v1831_v28 = vpop.eup %1830  ;;  %v567_v30 = vmul.f32 0.5, %v1829_v27 }
 0x77b   :  { %v568_v33 = vmul.f32 0.5, %v1831_v28 }
 0x77c   :  { %v569_v36 = vadd.f32 0.5, %v567_v30 }
 0x77d   :  { %v570_v35 = vadd.f32 0.5, %v568_v33 }
 0x77e   :  { %v573_v38 = vmul.f32 %v569_v36, %v480_v14 }
 0x77f   :  { %v572_v34 = vsel %vm233_vm3, %v1831_v28, %v570_v35 }
 0x780   :  { %v574_v39 = vmul.f32 %v572_v34, %v569_v36 }
 0x782   :  { %576 = vrot.lane.b32.xlu1 %v574_v39, %s1923_s0 }
 0x7f4   :  { %v577_v40 = vpop.permute.xlu1 %576 }
 0x7f5   :  { %v579_v43 = vadd.f32 %v577_v40, %v573_v38  ;;  %v781_v38 = vrot.slane %v2111_v47, 4 }
 0x7f7   :  { %1832 = vtanh.f32 %v579_v43 }
 0x801   :  { %v1833_v44 = vpop.eup %1832 }
 0x802   :  { %v2095_v45 = vmul.f32 %v1833_v44, %v572_v34 }
 0x804   :  { %583 = vrot.lane.b32.xlu0 %v2095_v45, %s1923_s0 }
 0x876   :  { %v584_v46 = vpop.permute.xlu0 %583 }
 0x877   :  { %1481 = vmatmul.mubr.msk.f32.vlgmr.msra.gmra.mrb[4].mxu0 %vm291_vm5, %v584_v46 }
 0x878   :  { %1694 = vmatpush1.bf16.msra.mxu0 %v2006_v59  ;;  %851 = vmatprep.mubr.f32.mxu0 %v1921_v21 }
 0x879   :  { %1696 = vmatprep.subr.bf16.mxu0 %v2008_v60 }
 0x87c   :  { %1698 = vmatpush1.bf16.msra.mxu0 %v2013_v1 }
 0x87d   :  { %1700 = vmatprep.subr.bf16.mxu0 %v2017_v2 }
 0x880   :  { %1702 = vmatpush1.bf16.msra.mxu0 %v2021_v7 }
 0x881   :  { %1704 = vmatprep.subr.bf16.mxu0 %v2025_v8 }
 0x884   :  { %1706 = vmatpush1.bf16.msra.mxu0 %v2029_v11 }
 0x885   :  { %1724 = vmatprep.subr.bf16.mxu0 %v2004_v55 }
 0x94a   :  { %v653_v49 = vpop.f32.mrb[4].mxu0 }
 0x94b   :  { %v654_v51 = vadd.f32 %v653_v49, %v2111_v47  ;;  %v655_v52 = vpop.f32.mrb[5].mxu0 }
 0x94c   :  { %v656_v53 = vadd.f32 %v655_v52, %v2115_v48 }
 0x94d   :  { %v658_v54 = vmul.f32 0.5, %v654_v51 }
 0x94e   :  { %v659_v56 = vmul.f32 %v656_v53, %v1987_v37 }
 0x94f   :  { %1834 = vtanh.f32 %v658_v54 }
 0x950   :  { %1836 = vtanh.f32 %v659_v56 }
 0x959   :  { %v1835_v55 = vpop.eup %1834 }
 0x95a   :  { %v1837_v57 = vpop.eup %1836  ;;  %v662_v58 = vmul.f32 0.5, %v1835_v55 }
 0x95b   :  { %v663_v41 = vmul.f32 0.5, %v1837_v57 }
 0x95c   :  { %v664_v62 = vadd.f32 0.5, %v662_v58 }
 0x95d   :  { %v665_v61 = vadd.f32 0.5, %v663_v41 }
 0x95e   :  { %v668_v0 = vmul.f32 %v664_v62, %v579_v43  ;;  %v782_v43 = vrot.slane %v2115_v48, 4 }
 0x95f   :  { %v667_v42 = vsel %vm233_vm3, %v1837_v57, %v665_v61  ;;  %v880_v61 = vrot.slane %v2111_v47, 6 }
 0x960   :  { %v669_v63 = vmul.f32 %v667_v42, %v664_v62 }
 0x962   :  { %671 = vrot.lane.b32.xlu1 %v669_v63, %s1923_s0 }
 0x9d4   :  { %v672_v3 = vpop.permute.xlu1 %671 }
 0x9d5   :  { %v674_v4 = vadd.f32 %v672_v3, %v668_v0 }
 0x9d7   :  { %1838 = vtanh.f32 %v674_v4 }
 0x9e1   :  { %v1839_v5 = vpop.eup %1838 }
 0x9e2   :  { %v2123_v6 = vmul.f32 %v1839_v5, %v667_v42  ;;  %v881_v42 = vrot.slane %v2115_v48, 6 }
 0x9e4   :  { %678 = vrot.lane.b32.xlu0 %v2123_v6, %s1923_s0 }
 0xa56   :  { %v679_v9 = vpop.permute.xlu0 %678 }
 0xa57   :  { %1482 = vmatmul.mubr.msk.f32.vlgmr.msra.gmra.mrb[8].mxu1 %vm291_vm5, %v679_v9 }
 0xa58   :  { %1710 = vmatpush1.bf16.msra.mxu1 %v2006_v59  ;;  %950 = vmatprep.mubr.f32.mxu1 %v1921_v21 }
 0xa59   :  { %1712 = vmatprep.subr.bf16.mxu1 %v2008_v60 }
 0xa5c   :  { %1714 = vmatpush1.bf16.msra.mxu1 %v2013_v1 }
 0xa5d   :  { %1716 = vmatprep.subr.bf16.mxu1 %v2017_v2 }
 0xa60   :  { %1718 = vmatpush1.bf16.msra.mxu1 %v2021_v7 }
 0xa61   :  { %1720 = vmatprep.subr.bf16.mxu1 %v2025_v8 }
 0xa64   :  { %1722 = vmatpush1.bf16.msra.mxu1 %v2029_v11 }
 0xb2a   :  { %v754_v12 = vpop.f32.mrb[8].mxu1 }
 0xb2b   :  { %v755_v14 = vadd.f32 %v754_v12, %v682_v10  ;;  %v756_v15 = vpop.f32.mrb[9].mxu1 }
 0xb2c   :  { %v757_v16 = vadd.f32 %v756_v15, %v683_v13 }
 0xb2d   :  { %v759_v18 = vmul.f32 0.5, %v755_v14 }
 0xb2e   :  { %v760_v19 = vmul.f32 %v757_v16, %v1987_v37 }
 0xb2f   :  { %1840 = vtanh.f32 %v759_v18 }
 0xb30   :  { %1842 = vtanh.f32 %v760_v19 }
 0xb39   :  { %v1841_v20 = vpop.eup %1840 }
 0xb3a   :  { %v1843_v22 = vpop.eup %1842  ;;  %v763_v23 = vmul.f32 0.5, %v1841_v20 }
 0xb3b   :  { %v764_v24 = vmul.f32 0.5, %v1843_v22 }
 0xb3c   :  { %v765_v26 = vadd.f32 0.5, %v763_v23 }
 0xb3d   :  { %v766_v25 = vadd.f32 0.5, %v764_v24 }
 0xb3e   :  { %v769_v30 = vmul.f32 %v765_v26, %v674_v4 }
 0xb3f   :  { %v768_v27 = vsel %vm233_vm3, %v1843_v22, %v766_v25  ;;  %v1108_v25 = vld [vmem:[#allocation2 + $0x220] sm:$0xff] }
 0xb40   :  { %v770_v28 = vmul.f32 %v768_v27, %v765_v26  ;;  %v1109_v26 = vld [vmem:[#allocation2 + $0x230] sm:$0xff] }
 0xb42   :  { %772 = vrot.lane.b32.xlu1 %v770_v28, %s1923_s0  ;;  %v1739_v28 = vpack.c.bf16 %v1109_v26, %v1108_v25  ;;  %v1107_v25 = vld [vmem:[#allocation2 + $0x210] sm:$0xff] }
 0xb44   :  { %1740 = vmatprep.subr.bf16.mxu1 %v1739_v28 }
 0xbb4   :  { %v773_v33 = vpop.permute.xlu1 %772 }
 0xbb5   :  { %v775_v35 = vadd.f32 %v773_v33, %v769_v30  ;;  %v1093_v30 = vld [vmem:[#allocation2 + $0x130] sm:$0xff]  ;;  %v1110_v33 = vld [vmem:[#allocation2 + $0x240] sm:$0xff] }
 0xbb7   :  { %1844 = vtanh.f32 %v775_v35 }
 0xbc1   :  { %v1845_v36 = vpop.eup %1844 }
 0xbc2   :  { %v2142_v34 = vmul.f32 %v1845_v36, %v768_v27  ;;  %v1092_v27 = vld [vmem:[#allocation2 + $0x120] sm:$0xff] }
 0xbc3   :  { %v1741_v36 = vpack.c.bf16 %v1093_v30, %v1092_v27 }
 0xbc4   :  { %779 = vrot.lane.b32.xlu0 %v2142_v34, %s1923_s0  ;;  %v1800_v23 = vpack.i.bf16 %v2055_v50, %v2142_v34 }
 0xc36   :  { %v780_v39 = vpop.permute.xlu0 %779 }
 0xc37   :  { %1483 = vmatmul.mubr.msk.f32.vlgmr.msra.gmra.mrb[6].mxu0 %vm291_vm5, %v780_v39 }
 0xc38   :  { %1726 = vmatpush1.bf16.msra.mxu0 %v2006_v59  ;;  %1045 = vmatprep.mubr.f32.mxu0 %v1921_v21 }
 0xc39   :  { %1728 = vmatprep.subr.bf16.mxu0 %v2008_v60 }
 0xc3c   :  { %1730 = vmatpush1.bf16.msra.mxu0 %v2013_v1 }
 0xc3d   :  { %1732 = vmatprep.subr.bf16.mxu0 %v2017_v2 }
 0xc40   :  { %1734 = vmatpush1.bf16.msra.mxu0 %v2021_v7 }
 0xc41   :  { %1736 = vmatprep.subr.bf16.mxu0 %v2025_v8 }
 0xc44   :  { %1738 = vmatpush1.bf16.msra.mxu0 %v2029_v11 }
 0xd0a   :  { %v853_v40 = vpop.f32.mrb[6].mxu0 }
 0xd0b   :  { %v854_v59 = vadd.f32 %v853_v40, %v781_v38  ;;  %v855_v44 = vpop.f32.mrb[7].mxu0  ;;  %v1094_v38 = vld [vmem:[#allocation2 + $0x140] sm:$0xff]  ;;  %v1095_v40 = vld [vmem:[#allocation2 + $0x150] sm:$0xff] }
 0xd0c   :  { %v856_v46 = vadd.f32 %v855_v44, %v782_v43  ;;  %v1112_v43 = vld [vmem:[#allocation2 + $0x260] sm:$0xff]  ;;  %v1745_v50 = vpack.c.bf16 %v1095_v40, %v1094_v38  ;;  %v1200_v38 = vld [vmem:[#allocation2 + $0x350] sm:$0xff]  ;;  %v1926_v40 = vmov 0.0|0.0  }
 0xd0d   :  { %v858_v49 = vmul.f32 0.5, %v854_v59  ;;  %v1113_v59 = vld [vmem:[#allocation2 + $0x270] sm:$0xff]  ;;  %v1096_v44 = vld [vmem:[#allocation2 + $0x160] sm:$0xff]  ;;  %1771 = vmatprep.subr.bf16.mxu0 %v1926_v40 }
 0xd0e   :  { %v859_v60 = vmul.f32 %v856_v46, %v1987_v37  ;;  %v1747_v34 = vpack.c.bf16 %v1113_v59, %v1112_v43  ;;  %v1097_v46 = vld [vmem:[#allocation2 + $0x170] sm:$0xff]  ;;  %v1201_v43 = vld [vmem:[#allocation2 + $0x360] sm:$0xff] }
 0xd0f   :  { %1846 = vtanh.f32 %v858_v49  ;;  %v1114_v49 = vld [vmem:[#allocation2 + $0x280] sm:$0xff]  ;;  %v1775_v59 = vpack.c.bf16 %v1201_v43, %v1200_v38 }
 0xd10   :  { %1848 = vtanh.f32 %v859_v60  ;;  %v1115_v60 = vld [vmem:[#allocation2 + $0x290] sm:$0xff] }
 0xd19   :  { %v1847_v1 = vpop.eup %1846 }
 0xd1a   :  { %v1849_v2 = vpop.eup %1848  ;;  %v862_v7 = vmul.f32 0.5, %v1847_v1  ;;  %v1749_v1 = vpack.c.bf16 %v1097_v46, %v1096_v44 }
 0xd1b   :  { %v863_v51 = vmul.f32 0.5, %v1849_v2 }
 0xd1c   :  { %v864_v52 = vadd.f32 0.5, %v862_v7  ;;  %v1098_v7 = vld [vmem:[#allocation2 + $0x180] sm:$0xff] }
 0xd1d   :  { %v865_v8 = vadd.f32 0.5, %v863_v51  ;;  %v1099_v51 = vld [vmem:[#allocation2 + $0x190] sm:$0xff] }
 0xd1e   :  { %v868_v54 = vmul.f32 %v864_v52, %v775_v35  ;;  %v1111_v35 = vld [vmem:[#allocation2 + $0x250] sm:$0xff] }
 0xd1f   :  { %v867_v11 = vsel %vm233_vm3, %v1849_v2, %v865_v8  ;;  %v1743_v39 = vpack.c.bf16 %v1111_v35, %v1110_v33  ;;  %v1751_v2 = vpack.c.bf16 %v1115_v60, %v1114_v49  ;;  %v1753_v8 = vpack.c.bf16 %v1099_v51, %v1098_v7 }
 0xd20   :  { %v869_v53 = vmul.f32 %v867_v11, %v864_v52 }
 0xd22   :  { %871 = vrot.lane.b32.xlu1 %v869_v53, %s1923_s0 }
 0xd94   :  { %v872_v56 = vpop.permute.xlu1 %871 }
 0xd95   :  { %v874_v55 = vadd.f32 %v872_v56, %v868_v54 }
 0xd97   :  { %1850 = vtanh.f32 %v874_v55 }
 0xda1   :  { %v1851_v57 = vpop.eup %1850 }
 0xda2   :  { %v876_v58 = vmul.f32 %v1851_v57, %v867_v11  ;;  %v1116_v57 = vld [vmem:[#allocation2 + $0x2a0] sm:$0xff] }
 0xda4   :  { %878 = vrot.lane.b32.xlu0 %v876_v58, %s1923_s0  ;;  %v1117_v58 = vld [vmem:[#allocation2 + $0x2b0] sm:$0xff] }
 0xe16   :  { %v2162_v41 = vpop.permute.xlu0 %878 }
 0xe17   :  { %1484 = vmatmul.mubr.msk.f32.vlgmr.msra.gmra.mrb[10].mxu1 %vm291_vm5, %v2162_v41 }
 0xe18   :  { %1742 = vmatpush3.bf16.msra.mxu1 %v1741_v36  ;;  %v1198_v36 = vld [vmem:[#allocation2 + $0x330] sm:$0xff] }
 0xe19   :  { %1744 = vmatprep.subr.bf16.mxu1 %v1743_v39  ;;  %v1199_v39 = vld [vmem:[#allocation2 + $0x340] sm:$0xff] }
 0xe1a   :  { %v1772_v29 = vpack.c.bf16 %v1199_v39, %v1198_v36 }
 0xe1c   :  { %1746 = vmatpush3.bf16.msra.mxu1 %v1745_v50 }
 0xe1d   :  { %1748 = vmatprep.subr.bf16.mxu1 %v1747_v34 }
 0xe20   :  { %1750 = vmatpush3.bf16.msra.mxu1 %v1749_v1 }
 0xe21   :  { %1752 = vmatprep.subr.bf16.mxu1 %v1751_v2 }
 0xe24   :  { %1754 = vmatpush3.bf16.msra.mxu1 %v1753_v8 }
 0xeea   :  { %v952_v62 = vpop.f32.mrb[10].mxu1 }
 0xeeb   :  { %v953_v63 = vadd.f32 %v952_v62, %v880_v61  ;;  %v954_v0 = vpop.f32.mrb[11].mxu1  ;;  %v1755_v61 = vpack.c.bf16 %v1117_v58, %v1116_v57  ;;  %v1100_v62 = vld [vmem:[#allocation2 + $0x1a0] sm:$0xff] }
 0xeec   :  { %v955_v3 = vadd.f32 %v954_v0, %v881_v42  ;;  %v1101_v42 = vld [vmem:[#allocation2 + $0x1b0] sm:$0xff]  ;;  %v1118_v0 = vld [vmem:[#allocation2 + $0x2c0] sm:$0xff] }
 0xeed   :  { %v957_v4 = vmul.f32 0.5, %v953_v63  ;;  %v1757_v63 = vpack.c.bf16 %v1101_v42, %v1100_v62  ;;  %1756 = vmatprep.subr.bf16.mxu1 %v1755_v61  ;;  %v1205_v57 = vld [vmem:[#allocation2 + $0x3a0] sm:$0xff] }
 0xeee   :  { %v958_v5 = vmul.f32 %v955_v3, %v1987_v37  ;;  %v1119_v3 = vld [vmem:[#allocation2 + $0x2d0] sm:$0xff]  ;;  %v1124_v61 = vld [vmem:[#allocation2 + $0x320] ss:$0 sm:$0xff] }
 0xeef   :  { %1852 = vtanh.f32 %v957_v4  ;;  %1758 = vmatpush3.bf16.msra.mxu1 %v1757_v63  ;;  %v1759_v4 = vpack.c.bf16 %v1119_v3, %v1118_v0  ;;  %v1288_v0 = vld [vmem:[#allocation2 + $0x400] sm:$0xff] }
 0xef0   :  { %1854 = vtanh.f32 %v958_v5  ;;  %v1103_v5 = vld [vmem:[#allocation2 + $0x1d0] sm:$0xff]  ;;  %v1283_v3 = vld [vmem:[#allocation2 + $0x3c0] sm:$0xff] }
 0xef1   :  { %1760 = vmatprep.subr.bf16.mxu1 %v1759_v4  ;;  %v1284_v4 = vld [vmem:[#allocation2 + $0x3d0] sm:$0xff] }
 0xef9   :  { %v1853_v9 = vpop.eup %1852 }
 0xefa   :  { %v1855_v10 = vpop.eup %1854  ;;  %v961_v12 = vmul.f32 0.5, %v1853_v9 }
 0xefb   :  { %v962_v13 = vmul.f32 0.5, %v1855_v10 }
 0xefc   :  { %v963_v15 = vadd.f32 0.5, %v961_v12  ;;  %v1121_v12 = vld [vmem:[#allocation2 + $0x2f0] sm:$0xff] }
 0xefd   :  { %v964_v14 = vadd.f32 0.5, %v962_v13 }
 0xefe   :  { %v967_v48 = vmul.f32 %v963_v15, %v874_v55 }
 0xeff   :  { %v966_v47 = vsel %vm233_vm3, %v1855_v10, %v964_v14  ;;  %v1120_v10 = vld [vmem:[#allocation2 + $0x2e0] sm:$0xff] }
 0xf00   :  { %v968_v16 = vmul.f32 %v966_v47, %v963_v15  ;;  %v1763_v15 = vpack.c.bf16 %v1121_v12, %v1120_v10  ;;  %v1286_v10 = vld [vmem:[#allocation2 + $0x3f0] sm:$0xff] }
 0xf02   :  { %970 = vrot.lane.b32.xlu1 %v968_v16, %s1923_s0  ;;  %v1122_v16 = vld [vmem:[#allocation2 + $0x300] sm:$0xff] }
 0xf74   :  { %v971_v18 = vpop.permute.xlu1 %970 }
 0xf75   :  { %v2172_v19 = vadd.f32 %v971_v18, %v967_v48  ;;  %v1123_v48 = vld [vmem:[#allocation2 + $0x310] sm:$0xff] }
 0xf77   :  { %1856 = vtanh.f32 %v2172_v19 }
 0xf81   :  { %v1857_v20 = vpop.eup %1856 }
 0xf82   :  { %v2175_v22 = vmul.f32 %v1857_v20, %v966_v47  ;;  %v1105_v47 = vld [vmem:[#allocation2 + $0x1f0] sm:$0xff] }
 0xf84   :  { %977 = vrot.lane.b32.xlu0 %v2175_v22, %s1923_s0  ;;  %v1805_v35 = vpack.i.bf16 %v2095_v45, %v2175_v22 }
 0xf88   :  { %1801 = vrot.lane.b32.xlu0 %v1800_v23, %s1924_s29  ;;  %v1767_v23 = vpack.c.bf16 %v1123_v48, %v1122_v16 }
 0xff6   :  { %v978_v24 = vpop.permute.xlu0 %977 }
 0xff7   :  { %1485 = vmatmul.mubr.msk.f32.vlgmr.msra.gmra.mrb[8].mxu0 %vm291_vm5, %v978_v24  ;;  %v1106_v24 = vld [vmem:[#allocation2 + $0x200] sm:$0xff] }
 0xff8   :  { %v1769_v30 = vpack.c.bf16 %v1107_v25, %v1106_v24  ;;  %1773 = vmatpush3.bf16.msra.mxu0 %v1772_v29  ;;  %1576 = vmatprep.mubr.msk.f32.mxu0 %vm1927_vm7, %v1921_v21 }
 0xff9   :  { %1774 = vmatprep.subr.bf16.mxu0 %v1926_v40 }
 0xffa   :  { %v1802_v34 = vpop.permute.xlu0 %1801 }
 0xffb   :  { %v1804_v46 = vunpack.i.h.bf16 %v1802_v34  ;;  %v1803_v49 = vunpack.i.l.bf16 %v1802_v34 }
 0xffc   :  { %1776 = vmatpush3.bf16.msra.mxu0 %v1775_v59 }
 0xffd   :  { %1777 = vmatprep.subr.bf16.mxu0 %v1926_v40  ;;  %v1085_v7 = vsel %vm143_vm2, %v1804_v46, %v2076_v17  ;;  %v1089_v8 = vsel %vm143_vm2, %v1803_v49, %v2162_v41  ;;  %v1204_v17 = vld [vmem:[#allocation2 + $0x390] sm:$0xff] }
 0xffe   :  { %v1781_v58 = vpack.c.bf16 %v1205_v57, %v1204_v17 }
0x10ca   :  { %v1047_v52 = vpop.f32.mrb[8].mxu0 }
0x10cb   :  { %v1048_v11 = vadd.f32 %v1047_v52, %v1977_v31  ;;  %v1049_v53 = vpop.f32.mrb[9].mxu0  ;;  %v1102_v31 = vld [vmem:[#allocation2 + $0x1c0] sm:$0xff] }
0x10cc   :  { %v1050_v54 = vadd.f32 %v1049_v53, %v1980_v32  ;;  %v1761_v32 = vpack.c.bf16 %v1103_v5, %v1102_v31  ;;  %v1287_v5 = vld [vmem:[%s2234_s2] sm:$0x3]  ;;  %s1928_s2 = smov [#allocation5]  }
0x10cd   :  { %v1052_v56 = vmul.f32 0.5, %v1048_v11  ;;  %s1463_s6 = sshll.u32 %s1928_s2, 4  ;;  %s1464_s6 = int_to_ptr.vmem [resolvable:$true] %s1463_s6 }
0x10ce   :  { %v1053_v55 = vmul.f32 %v1050_v54, %v1987_v37  ;;  %v1104_v37 = vld [vmem:[#allocation2 + $0x1e0] sm:$0xff]  ;;  %1762 = vmatpush3.bf16.msra.mxu1 %v1761_v32  ;;  %v1202_v54 = vld [vmem:[#allocation2 + $0x370] sm:$0xff]  ;;  %s1892_s7 = scalar_lea.vmem %s1464_s6, 32  ;;  %p1897_p9 = scmp.lt.s32.totalorder %s1464_s6, %s1464_s6 }
0x10cf   :  { %1858 = vtanh.f32 %v1052_v56  ;;  %v1765_v20 = vpack.c.bf16 %v1105_v47, %v1104_v37  ;;  %1764 = vmatprep.subr.bf16.mxu1 %v1763_v15  ;;  %v1203_v56 = vld [vmem:[#allocation2 + $0x380] sm:$0xff]  ;;  %v1206_v37 = vld [vmem:[#allocation2 + $0x3b0] ss:$0 sm:$0xff]  ;;  %p1893_p8 = scmp.ne.s32.totalorder %s1464_s6, %s1892_s7  ;;  %p1898_p10 = scmp.lt.s32.totalorder %s1892_s7, %s1892_s7 }
0x10d0   :  { %1860 = vtanh.f32 %v1053_v55  ;;  %v1778_v55 = vpack.c.bf16 %v1203_v56, %v1202_v54  ;;  %v1285_v32 = vld [vmem:[#allocation2 + $0x3e0] sm:$0xff] }
0x10d1   :  { %v1787_v12 = vpack.c.bf16 %v1286_v10, %v1285_v32  ;;  %p1899_p11 = por %p1898_p10, %p1897_p9 }
0x10d2   :  { %1766 = vmatpush3.bf16.msra.mxu1 %v1765_v20  ;;  %1779 = vmatpush3.bf16.msra.mxu0 %v1778_v55 }
0x10d3   :  { %1768 = vmatprep.subr.bf16.mxu1 %v1767_v23  ;;  %1780 = vmatprep.subr.bf16.mxu0 %v1926_v40  ;;  %v1436_v23 = vld [vmem:[#allocation2 + $0x410] ss:$0 sm:$0xff]  ;;  %p1900_p12 = pnand %p1899_p11, %p1893_p8 }
0x10d6   :  { %1770 = vmatpush3.bf16.msra.mxu1 %v1769_v30  ;;  %1782 = vmatpush3.bf16.msra.mxu0 %v1781_v58 }
0x10d7   :  { %1579 = vmatprep.subr.mxu0 %v1921_v21 }
0x10d9   :  { %v1859_v9 = vpop.eup %1858 }
0x10da   :  { %v1861_v13 = vpop.eup %1860  ;;  %v1056_v14 = vmul.f32 0.5, %v1859_v9  ;;  %v1784_v9 = vpack.c.bf16 %v1284_v4, %v1283_v3 }
0x10db   :  { %v1057_v18 = vmul.f32 0.5, %v1861_v13 }
0x10dc   :  { %v1058_v27 = vadd.f32 0.5, %v1056_v14 }
0x10dd   :  { %v1059_v26 = vadd.f32 0.5, %v1057_v18 }
0x10de   :  { %v1062_v50 = vmul.f32 %v1058_v27, %v2172_v19 }
0x10df   :  { %v1061_v28 = vsel %vm233_vm3, %v1861_v13, %v1059_v26 }
0x10e0   :  { %v1063_v33 = vmul.f32 %v1061_v28, %v1058_v27 }
0x10e2   :  { %1065 = vrot.lane.b32.xlu1 %v1063_v33, %s1923_s0 }
0x10e6   :  { %1806 = vrot.lane.b32.xlu1 %v1805_v35, %s1925_s30 }
0x1154   :  { %v1066_v45 = vpop.permute.xlu1 %1065 }
0x1155   :  { %v1068_v22 = vadd.f32 %v1066_v45, %v1062_v50 }
0x1157   :  { %1862 = vtanh.f32 %v1068_v22 }
0x1158   :  { %v1807_v44 = vpop.permute.xlu1 %1806 }
0x1159   :  { %v1809_v60 = vunpack.i.h.bf16 %v1807_v44  ;;  %v1808_v1 = vunpack.i.l.bf16 %v1807_v44 }
0x115b   :  { %v1086_v19 = vsel %vm291_vm5, %v1085_v7, %v1809_v60  ;;  %v1090_v52 = vsel %vm291_vm5, %v1089_v8, %v1808_v1 }
0x115c   :  { %v1088_v53 = vsel %vm1087_vm6, %v1086_v19, %v2123_v6 }
0x1161   :  { %v1863_v2 = vpop.eup %1862 }
0x1162   :  { %v1070_v51 = vmul.f32 %v1863_v2, %v1061_v28 }
0x1164   :  { %v1091_v11 = vsel %vm1087_vm6, %v1090_v52, %v1070_v51 }
0x1165   :  { %1189 = vmatprep.mubr.f32.mxu1 %v1091_v11 }
0x1166   :  { %1190 = vmatmul.mubr.f32.vlgmr.msra.gmra.mrb[12].mxu1 %v1088_v53 }
0x1239   :  { %v1528_v41 = vpop.f32.mrb[12].mxu1 }
0x123a   :  { %v1529_v6 = vpop.f32.mrb[13].mxu1 }
0x123b   :  { %v1530_v62 = vadd.f32 %v1529_v6, %v1528_v41 }
0x123d   :  { %v1192_v42 = vadd.f32 %v1530_v62, %v1124_v61 }
0x123f   :  { %vm1195_vm8 = vcmp.gt.f32.partialorder %v1192_v42, 0.0  ;;  %v1196_v63 = vmul.f32 0.01, %v1192_v42 }
0x1241   :  { %v1197_v31 = vsel %vm1195_vm8, %v1192_v42, %v1196_v63 }
0x1242   :  { %1577 = vmatmul.mubr.msk.f32.vlgmr.msra.gmra.mrb[10].mxu0 %vm291_vm5, %v1197_v31 }
0x1243   :  { %1580 = vmatpush3.msra.mxu0 %v1288_v0  ;;  %1581 = vmatprep.mubr.msk.f32.mxu0 %vm1927_vm7, %v1921_v21 }
0x1244   :  { %1783 = vmatprep.subr.bf16.mxu0 %v1926_v40 }
0x1246   :  { %1582 = vmatmul.mubr.msk.f32.vlgmr.msra.gmra.mrb[12].mxu0 %vm1289_vm9, %v1287_v5 }
0x1247   :  { %1785 = vmatpush3.bf16.msra.mxu0 %v1784_v9  ;;  %1592 = vmatprep.mubr.msk.f32.mxu0 %vm1927_vm7, %v1921_v21 }
0x1248   :  { %1786 = vmatprep.subr.bf16.mxu0 %v1926_v40 }
0x124b   :  { %1788 = vmatpush3.bf16.msra.mxu0 %v1787_v12 }
0x1315   :  { %v1276_v13 = vpop.f32.mrb[10].mxu0 }
0x1316   :  { %v1277_v14 = vadd.f32 %v1276_v13, %v1206_v37  ;;  %v1578_v15 = vpop.f32.mrb[11].mxu0 }
0x1318   :  { %vm1280_vm10 = vcmp.gt.f32.partialorder %v1277_v14, 0.0  ;;  %v1281_v47 = vmul.f32 0.01, %v1277_v14 }
0x1319   :  { %v1359_v16 = vpop.f32.mrb[12].mxu0 }
0x131a   :  { %v1282_v48 = vsel %vm1280_vm10, %v1277_v14, %v1281_v47  ;;  %v1583_v18 = vpop.f32.mrb[13].mxu0 }
0x131b   :  { %1593 = vmatmul.mubr.msk.f32.vlgmr.msra.gmra.mrb[14].mxu0 %vm143_vm2, %v1282_v48 }
0x13ee   :  { %v1432_v20 = vpop.f32.mrb[14].mxu0 }
0x13ef   :  { %v1433_v21 = vadd.f32 %v1432_v20, %v1359_v16  ;;  %v1594_v24 = vpop.f32.mrb[15].mxu0 }
0x13f1   :  { %v1437_v25 = vadd.f32 %v1436_v23, %v1433_v21 }
0x13f3   :  { %v1438_v26 = vmul.f32 %v1437_v25, %v1437_v25 }
0x13f5   :  { %v1440_v27 = vsel %vm1439_vm11, %v1438_v26, 0.0 }
0x13f6   :  { %1441 = vadd.xlane.f32.xlu0 %v1440_v27 }
0x1483   :  { %v1442_v28 = vpop.xlane.xlu0 %1441 }
0x1484   :  { %1864 = vrsqrt.f32 %v1442_v28 }
0x148e   :  { %v1865_v30 = vpop.eup %1864 }
0x148f   :  { %v1444_v33 = vmul.f32 %v1865_v30, %v1437_v25 }
0x1491   :  { %v1445_v35 = vsel %vm1439_vm11, %v1444_v33, -inf }
0x1492   :  { %1446 = vmax.xlane.f32.xlu1 %v1445_v35 }
0x151f   :  { %v1447_v36 = vpop.xlane.xlu1 %1446 }
0x1520   :  { %v1448_v39 = vsub.f32 %v1444_v33, %v1447_v36 }
0x1522   :  { %v1449_v38 = vmul.f32 1.442695, %v1448_v39 }
0x1524   :  { %1866 = vpow2.f32 %v1449_v38 }
0x152e   :  { %v1867_v40 = vpop.eup %1866 }
0x152f   :  { %v1451_v29 = vsel %vm1439_vm11, %v1867_v40, 0.0 }
0x1530   :  { %1452 = vadd.xlane.f32.xlu0 %v1451_v29 }
0x15bd   :  { %v1453_v43 = vpop.xlane.xlu0 %1452 }
0x15be   :  { %1868 = vrcp.f32 %v1453_v43 }
0x15c8   :  { %v1869_v59 = vpop.eup %1868 }
0x15c9   :  { %v1455_v50 = vmul.f32 %v1869_v59, %v1867_v40 }
0x15cb   :  { %1456 = vst.msk [vmem:[#allocation5] sm:$0x3] %vm1439_vm11, %v1455_v50 }
0x15cc   :  { %1903 = shalt.err (!%p1900_p12)
}
0x15cd   :  { %s1904_s10 = scalar_lea.hbm %s2235_s3, 32 }
0x15ce   :  { %p1905_p13 = scmp.ne.s32.totalorder %s2235_s3, %s1904_s10  ;;  %p1908_p0 = scmp.lt.u32.totalorder %s1904_s10, %s2235_s3 }
0x15d0   :  { %p1910_p1 = pnand %p1908_p0, %p1905_p13 }
0x15d2   :  { %1913 = shalt.err (!%p1910_p1)
}
0x15d3   :  { %1466 = dma.vmem_to_hbm [thread:$0]  %s1464_s6, 32, %s2235_s3, [#allocation4]  }
0x15d4   :  { %1916 = dma.done.wait [#allocation4], 32  }
0x15d5   :  { %1917 = vsyncadd [#allocation4], 4294967264 }
0x15d6   :  { %1470 = vsyncpa [#allocation3], 1 }
0x15d7   :  { %1471 = vsyncpa [#allocation4], 1 }

</bundles_post_ra>
